<compile_context>
chip_gen: v7x
topology: tpu7x:2x2x1
jax: 0.10.0
libtpu: 0.0.40
codegen_flags: <defaults>
</compile_context>

<pallas_src>
import functools
import math

import jax
import jax.numpy as jnp
from jax.experimental import pallas as pl
from jax.experimental.pallas import tpu as pltpu


def _round_up(x, m):
    return ((x + m - 1) // m) * m


def _pick_band(ho, wo, band_rows=None):
    """Output rows per band.  th must divide Ho, and th*Wo must be a multiple
    of 128 (one full lane tile) or equal Ho*Wo, so the NCHW-flat output block
    (and the residual input block) is lane-dense and tile-aligned."""
    if band_rows is not None:
        assert ho % band_rows == 0, (ho, band_rows)
        assert (band_rows * wo) % 128 == 0 or band_rows == ho, (band_rows, wo)
        return band_rows
    for d in range(1, ho + 1):
        if ho % d == 0 and (d * wo) % 128 == 0:
            return d
    # TODO(synk): for very large Ho*Wo a full-image band can exceed the VMEM
    #             budget; switch to per-band manual halo DMA in that regime.
    return ho


def fold_bn(gamma, beta, mean, var, eps=1e-5):
    scale = gamma / jnp.sqrt(var + eps)
    bias = beta - mean * scale
    return scale, bias


# ---------------------------------------------------------------------------
# Fused kernels
# ---------------------------------------------------------------------------

def _fused_ir_s1_kernel(*refs, th, W, use_res, has_expand, mxu_dtype):
    """stride=1 band: expand -> depthwise 3x3 -> project (+ residual)."""
    i = 0
    x_ref = refs[i]; i += 1
    if use_res:
        xres_ref = refs[i]; i += 1
    if has_expand:
        we_ref = refs[i]; i += 1
    wd_ref, bd_ref, wpt_ref, bpt_ref, o_ref = refs[i:]

    b = pl.program_id(1)
    th_in = th + 2                      # band rows incl. 3x3 halo
    wp_pad = x_ref.shape[2]             # padded (8-aligned) width
    cin_aug = x_ref.shape[3]            # cin (+1 indicator channel if expand)
    row0 = pl.multiple_of(b * th, th)   # band start in padded-row coords

    xb = x_ref[0, pl.ds(row0, th_in), :, :]          # (th_in, wp_pad, cin_aug)

    if has_expand:
        hidden = we_ref.shape[1]
        # 1x1 expand.  BN scale folded into we; BN bias rides on the all-ones
        # indicator channel, which is zero on the spatial zero padding, so the
        # padded hidden tensor is exactly zero without any masking.
        h = jnp.dot(xb.reshape(th_in * wp_pad, cin_aug).astype(mxu_dtype),
                    we_ref[...], preferred_element_type=jnp.float32)
        h = jnp.clip(h, 0.0, 6.0).reshape(th_in, wp_pad, hidden)
    else:
        hidden = cin_aug
        h = xb.astype(jnp.float32)      # padding is already exact zeros

    # 3x3 depthwise, stride 1 (BN scale pre-folded into wd).  Column slices
    # hoisted out of the 9-tap loop; row slices are leading-dim (free).
    wd = wd_ref[...]                    # (3, 3, hidden)
    h_cols = tuple(h[:, dj:dj + W, :] for dj in range(3))
    acc = jnp.zeros((th, W, hidden), jnp.float32)
    for di in range(3):
        for dj in range(3):
            acc = acc + h_cols[dj][di:di + th] * wd[di, dj]
    acc = jnp.clip(acc + bd_ref[...], 0.0, 6.0)

    # 1x1 projection, channel-major so the store is lane-dense and NCHW-native:
    # y_t = w_proj^T @ acc^T -> (oup, th*W), spatial on lanes.
    accm = acc.reshape(th * W, hidden).astype(mxu_dtype)
    y_t = jnp.dot(wpt_ref[...], accm.T,
                  preferred_element_type=jnp.float32) + bpt_ref[...]
    if use_res:
        y_t = y_t + xres_ref[0]         # NCHW-flat residual slab (oup, th*W)
    o_ref[0] = y_t.astype(o_ref.dtype)


def _fused_ir_s2_kernel(*refs, th, W, has_expand, mxu_dtype):
    """stride=2 band: only the needed output positions are computed.

    The wrapper supplies even/odd column planes of the padded input; row
    striding is done with a leading-dim parity reshape, so every depthwise tap
    is a contiguous slice."""
    i = 0
    xe_ref = refs[i]; i += 1
    xo_ref = refs[i]; i += 1
    if has_expand:
        we_ref = refs[i]; i += 1
    wd_ref, bd_ref, wpt_ref, bpt_ref, o_ref = refs[i:]

    b = pl.program_id(1)
    wo = W // 2
    th_in = 2 * th + 2
    we_pad = xe_ref.shape[2]
    cin_aug = xe_ref.shape[3]
    row0 = pl.multiple_of(b * (2 * th), 2 * th)

    xe = xe_ref[0, pl.ds(row0, th_in), :, :]   # even padded cols 0,2,...
    xo = xo_ref[0, pl.ds(row0, th_in), :, :]   # odd  padded cols 1,3,...

    if has_expand:
        hidden = we_ref.shape[1]

        def expand(xp):
            z = jnp.dot(xp.reshape(th_in * we_pad, cin_aug).astype(mxu_dtype),
                        we_ref[...], preferred_element_type=jnp.float32)
            return jnp.clip(z, 0.0, 6.0).reshape(th_in, we_pad, hidden)

        he, ho = expand(xe), expand(xo)
    else:
        hidden = cin_aug
        he, ho = xe.astype(jnp.float32), xo.astype(jnp.float32)

    # Row-parity split: plane[2*i + di] for output row i (leading dims only).
    he4 = he.reshape(th + 1, 2, we_pad, hidden)
    ho4 = ho.reshape(th + 1, 2, we_pad, hidden)
    he_rows = (he4[0:th, 0], he4[0:th, 1], he4[1:th + 1, 0])
    ho_rows = (ho4[0:th, 0], ho4[0:th, 1], ho4[1:th + 1, 0])

    wd = wd_ref[...]
    acc = jnp.zeros((th, wo, hidden), jnp.float32)
    for di in range(3):
        acc = acc + he_rows[di][:, 0:wo, :] * wd[di, 0]        # dj=0 -> even col j
        acc = acc + ho_rows[di][:, 0:wo, :] * wd[di, 1]        # dj=1 -> odd  col j
        acc = acc + he_rows[di][:, 1:wo + 1, :] * wd[di, 2]    # dj=2 -> even col j+1
    acc = jnp.clip(acc + bd_ref[...], 0.0, 6.0)

    accm = acc.reshape(th * wo, hidden).astype(mxu_dtype)
    y_t = jnp.dot(wpt_ref[...], accm.T,
                  preferred_element_type=jnp.float32) + bpt_ref[...]
    o_ref[0] = y_t.astype(o_ref.dtype)


# ---------------------------------------------------------------------------
# Wrapper
# ---------------------------------------------------------------------------

def inverted_residual_pallas(x_nchw, params, *, inp, oup, stride, expand_ratio,
                             band_rows=None, mxu_dtype=jnp.bfloat16):
    assert stride in (1, 2)
    N, cin, H, W = x_nchw.shape
    assert cin == inp
    has_expand = expand_ratio != 1
    use_res = (stride == 1) and (inp == oup)
    hidden = int(round(inp * expand_ratio))

    x_nchw = x_nchw.astype(jnp.float32)
    # NCHW -> NHWC for the compute path.  The output is produced NCHW-flat by
    # the kernel, so there is no output transpose pass any more.
    # TODO(synk): an NHWC end-to-end model would drop this input transpose too.
    x = jnp.transpose(x_nchw, (0, 2, 3, 1))

    # Fold eval-mode BN scale into the conv weights.
    if has_expand:
        s, be = fold_bn(*params["bn_exp"])
        # BN bias appended as an extra input row, paired with an all-ones
        # indicator channel appended to the input.
        w_exp = jnp.concatenate([params["w_exp"] * s[None, :], be[None, :]],
                                axis=0).astype(mxu_dtype)
    s, bd = fold_bn(*params["bn_dw"])
    w_dw = (params["w_dw"] * s[None, None, :]).astype(jnp.float32)
    bd = bd.reshape(1, hidden).astype(jnp.float32)
    s, bp = fold_bn(*params["bn_proj"])
    w_pr_t = jnp.transpose(params["w_proj"] * s[None, :]).astype(mxu_dtype)  # (oup, hidden)
    bp_t = bp.reshape(oup, 1).astype(jnp.float32)

    if stride == 2:
        assert H % 2 == 0 and W % 2 == 0, "stride-2 path assumes even H, W"
    Ho = H if stride == 1 else H // 2
    Wo = W if stride == 1 else W // 2
    th = _pick_band(Ho, Wo, band_rows)      # output rows per band
    nb = Ho // th
    Hp = H + 2

    if has_expand:
        x_aug = jnp.concatenate([x, jnp.ones((N, H, W, 1), x.dtype)], axis=-1)
    else:
        x_aug = x
    cin_aug = x_aug.shape[-1]

    def wspec(shape):
        return pl.BlockSpec(shape, lambda n, b, _s=shape: (0,) * len(_s))

    # TODO(synk): weights never change across the grid; pl.Buffered(1) (or a
    #             VMEM-resident untiled spec) would drop their double buffer.
    weight_args, weight_specs = [], []
    if has_expand:
        weight_args += [w_exp]
        weight_specs += [wspec((cin_aug, hidden))]
    weight_args += [w_dw, bd, w_pr_t, bp_t]
    weight_specs += [wspec((3, 3, hidden)), wspec((1, hidden)),
                     wspec((oup, hidden)), wspec((oup, 1))]

    if stride == 1:
        wp_raw = W + 2
        wp_pad = _round_up(wp_raw, 8)       # sublane-aligns in-kernel slices
        x_pad = jnp.pad(x_aug, ((0, 0), (1, 1), (1, 1 + wp_pad - wp_raw), (0, 0)))
        kernel = functools.partial(
            _fused_ir_s1_kernel, th=th, W=W,
            use_res=use_res, has_expand=has_expand, mxu_dtype=mxu_dtype)
        in_specs = [pl.BlockSpec((1, Hp, wp_pad, cin_aug), lambda n, b: (n, 0, 0, 0))]
        args = [x_pad]
        if use_res:
            # Residual slab, already NCHW-flat and lane-dense: (N, cin, H*W).
            in_specs.append(pl.BlockSpec((1, cin, th * W), lambda n, b: (n, 0, b)))
            args.append(x_nchw.reshape(N, cin, H * W))
        in_specs += weight_specs
        args += weight_args
        in_cols, rows_in, n_planes = wp_pad, th + 2, 1
    else:
        we_raw = Wo + 1
        we_pad = _round_up(we_raw, 8)
        x_p = jnp.pad(x_aug, ((0, 0), (1, 1), (1, 1), (0, 0)))
        # TODO(synk): the even/odd column split is still a wrapper-side pass
        #             over the small un-expanded input.
        x_even = jnp.pad(x_p[:, :, 0::2, :],
                         ((0, 0), (0, 0), (0, we_pad - we_raw), (0, 0)))
        x_odd = jnp.pad(x_p[:, :, 1::2, :],
                        ((0, 0), (0, 0), (0, we_pad - we_raw), (0, 0)))
        kernel = functools.partial(
            _fused_ir_s2_kernel, th=th, W=W,
            has_expand=has_expand, mxu_dtype=mxu_dtype)
        plane_spec = pl.BlockSpec((1, Hp, we_pad, cin_aug), lambda n, b: (n, 0, 0, 0))
        in_specs = [plane_spec, plane_spec] + weight_specs
        args = [x_even, x_odd] + weight_args
        in_cols, rows_in, n_planes = we_pad, 2 * th + 2, 2

    # Explicit VMEM budget (v5e scoped default is only 16 MiB; v7x has 64 MiB
    # physical, so keep the request modest but sufficient).
    x_block_bytes = n_planes * Hp * in_cols * cin_aug * 4
    hid_bytes = 3 * n_planes * rows_in * in_cols * hidden * 4
    out_block_bytes = oup * th * Wo * 4
    w_bytes = sum(int(math.prod(w.shape)) * w.dtype.itemsize for w in weight_args)
    est = 2 * x_block_bytes + 2 * out_block_bytes + 2 * w_bytes + hid_bytes + (2 << 20)
    vmem_limit = int(min(max(2 * est, 32 << 20), 48 << 20))

    out_flat = pl.pallas_call(
        kernel,
        out_shape=jax.ShapeDtypeStruct((N, oup, Ho * Wo), jnp.float32),
        grid=(N, nb),
        in_specs=in_specs,
        out_specs=pl.BlockSpec((1, oup, th * Wo), lambda n, b: (n, 0, b)),
        compiler_params=pltpu.CompilerParams(
            dimension_semantics=("parallel", "parallel"),
            vmem_limit_bytes=vmem_limit),
    )(*args)

    return out_flat.reshape(N, oup, Ho, Wo)    # already NCHW


# ---------------------------------------------------------------------------
# Parameters + pure-JAX reference (mirrors the PyTorch forward, eval-mode BN)
# ---------------------------------------------------------------------------

def make_inverted_residual_params(key, inp, oup, expand_ratio):
    hidden = int(round(inp * expand_ratio))
    keys = jax.random.split(key, 12)
    p = {}
    if expand_ratio != 1:
        p["w_exp"] = jax.random.normal(keys[0], (inp, hidden), jnp.float32) * 0.1
        p["bn_exp"] = (
            1.0 + 0.1 * jax.random.normal(keys[1], (hidden,), jnp.float32),
            0.1 * jax.random.normal(keys[2], (hidden,), jnp.float32),
            0.1 * jax.random.normal(keys[3], (hidden,), jnp.float32),
            1.0 + 0.1 * jax.random.uniform(keys[4], (hidden,), jnp.float32),
        )
    p["w_dw"] = jax.random.normal(keys[5], (3, 3, hidden), jnp.float32) * 0.1
    p["bn_dw"] = (
        1.0 + 0.1 * jax.random.normal(keys[6], (hidden,), jnp.float32),
        0.1 * jax.random.normal(keys[7], (hidden,), jnp.float32),
        0.1 * jax.random.normal(keys[8], (hidden,), jnp.float32),
        1.0 + 0.1 * jax.random.uniform(keys[9], (hidden,), jnp.float32),
    )
    p["w_proj"] = jax.random.normal(keys[10], (hidden, oup), jnp.float32) * 0.1
    p["bn_proj"] = (
        1.0 + 0.1 * jax.random.normal(keys[11], (oup,), jnp.float32),
        jnp.zeros((oup,), jnp.float32),
        jnp.zeros((oup,), jnp.float32),
        jnp.ones((oup,), jnp.float32),
    )
    return p, hidden


def inverted_residual_ref(x_nchw, params, *, inp, oup, stride, expand_ratio):
    use_res = (stride == 1) and (inp == oup)
    hidden = int(round(inp * expand_ratio))
    dn = ("NCHW", "OIHW", "NCHW")

    def bn_apply(y, bn):
        s, b = fold_bn(*bn)
        return y * s[None, :, None, None] + b[None, :, None, None]

    h = x_nchw
    if expand_ratio != 1:
        w = jnp.transpose(params["w_exp"], (1, 0))[:, :, None, None]
        h = jax.lax.conv_general_dilated(h, w, (1, 1), "VALID", dimension_numbers=dn)
        h = jnp.clip(bn_apply(h, params["bn_exp"]), 0.0, 6.0)

    w_dw = jnp.transpose(params["w_dw"], (2, 0, 1))[:, None, :, :]
    h = jax.lax.conv_general_dilated(
        h, w_dw, (stride, stride), ((1, 1), (1, 1)),
        dimension_numbers=dn, feature_group_count=hidden)
    h = jnp.clip(bn_apply(h, params["bn_dw"]), 0.0, 6.0)

    w_p = jnp.transpose(params["w_proj"], (1, 0))[:, :, None, None]
    h = jax.lax.conv_general_dilated(h, w_p, (1, 1), "VALID", dimension_numbers=dn)
    h = bn_apply(h, params["bn_proj"])

    return x_nchw + h if use_res else h


# ---------------------------------------------------------------------------

if __name__ == "__main__":
    key = jax.random.PRNGKey(0)
    N, H, W = 2, 16, 16
    cases = [
        dict(inp=4, oup=4, stride=1, expand_ratio=4),   # expand + residual
        dict(inp=4, oup=8, stride=2, expand_ratio=4),   # stride-2 downsample
        dict(inp=4, oup=4, stride=1, expand_ratio=1),   # no expand, residual
    ]
    for i, cfg in enumerate(cases):
        key, kx, kp = jax.random.split(key, 3)
        x = jax.random.normal(kx, (N, cfg["inp"], H, W), jnp.float32)
        params, _ = make_inverted_residual_params(
            kp, cfg["inp"], cfg["oup"], cfg["expand_ratio"])

        ref = jax.block_until_ready(inverted_residual_ref(x, params, **cfg))

        # bf16 MXU (default) with a looser tolerance, plus an f32 MXU run with
        # a tight tolerance to pin down the kernel math.
        for mxu_dtype, tol in ((jnp.bfloat16, 2e-2), (jnp.float32, 1e-4)):
            out = inverted_residual_pallas(x, params, mxu_dtype=mxu_dtype, **cfg)
            out = jax.block_until_ready(out)
            assert out.shape == ref.shape, (i, out.shape, ref.shape)
            err = float(jnp.max(jnp.abs(out - ref)))
            assert jnp.allclose(out, ref, rtol=tol, atol=tol), (i, str(mxu_dtype), err)

    print("KERNEL_OK")
</pallas_src>

<mosaic_0001>
module attributes {stable_mosaic.version = 11 : i64} {
  func.func @_fused_ir_s1_kernel(%arg0: i32, %arg1: i32, %arg2: memref<1x18x24x5xf32, #tpu.memory_space<vmem>>, %arg3: memref<1x4x128xf32, #tpu.memory_space<vmem>>, %arg4: memref<5x16xbf16, #tpu.memory_space<vmem>>, %arg5: memref<3x3x16xf32, #tpu.memory_space<vmem>>, %arg6: memref<1x16xf32, #tpu.memory_space<vmem>>, %arg7: memref<4x16xbf16, #tpu.memory_space<vmem>>, %arg8: memref<4x1xf32, #tpu.memory_space<vmem>>, %arg9: memref<1x4x128xf32, #tpu.memory_space<vmem>>) attributes {dimension_semantics = [#tpu.dimension_semantics<parallel>, #tpu.dimension_semantics<parallel>], iteration_bounds = array<i64: 2, 2>, scalar_prefetch = 0 : i64, scratch_operands = 0 : i64, tpu.core_type = #tpu.core_type<tc>, window_params = [{transform_indices = @transform_0, window_bounds = array<i64: 1, 18, 24, 5>}, {transform_indices = @transform_1, window_bounds = array<i64: 1, 4, 128>}, {pipeline_mode = #tpu.pipeline_mode<synchronous>, transform_indices = @transform_2, window_bounds = array<i64: 5, 16>}, {pipeline_mode = #tpu.pipeline_mode<synchronous>, transform_indices = @transform_3, window_bounds = array<i64: 3, 3, 16>}, {pipeline_mode = #tpu.pipeline_mode<synchronous>, transform_indices = @transform_4, window_bounds = array<i64: 1, 16>}, {pipeline_mode = #tpu.pipeline_mode<synchronous>, transform_indices = @transform_5, window_bounds = array<i64: 4, 16>}, {pipeline_mode = #tpu.pipeline_mode<synchronous>, transform_indices = @transform_6, window_bounds = array<i64: 4, 1>}, {transform_indices = @transform_7, window_bounds = array<i64: 1, 4, 128>}]} {
    %c8_i32 = arith.constant 8 : i32
    %0 = arith.muli %arg1, %c8_i32 : i32
    %1 = tpu.assume_multiple %0, 8 : i32
    %c0 = arith.constant 0 : index
    %2 = arith.index_cast %1 : i32 to index
    %c0_0 = arith.constant 0 : index
    %c0_1 = arith.constant 0 : index
    %3 = vector.load %arg2[%c0, %2, %c0_0, %c0_1] : memref<1x18x24x5xf32, #tpu.memory_space<vmem>>, vector<1x10x24x5xf32>
    %4 = vector.shape_cast %3 : vector<1x10x24x5xf32> to vector<10x24x5xf32>
    %5 = vector.shape_cast %4 : vector<10x24x5xf32> to vector<240x5xf32>
    %6 = arith.truncf %5 : vector<240x5xf32> to vector<240x5xbf16>
    %c0_2 = arith.constant 0 : index
    %c0_3 = arith.constant 0 : index
    %7 = vector.load %arg4[%c0_2, %c0_3] : memref<5x16xbf16, #tpu.memory_space<vmem>>, vector<5x16xbf16>
    %cst = arith.constant dense<0.000000e+00> : vector<240x16xf32>
    %8 = tpu.matmul %6, %7, %cst {dimension_numbers = #tpu.dot_dimension_numbers<[1], [0], [0], [1], [0, 0, 1, 1], [], []>} : vector<240x5xbf16>, vector<5x16xbf16>, vector<240x16xf32> -> vector<240x16xf32>
    %cst_4 = arith.constant 0.000000e+00 : f32
    %cst_5 = arith.constant 6.000000e+00 : f32
    %9 = vector.broadcast %cst_4 : f32 to vector<240x16xf32>
    %10 = arith.maximumf %9, %8 : vector<240x16xf32>
    %11 = vector.broadcast %cst_5 : f32 to vector<240x16xf32>
    %12 = arith.minimumf %11, %10 : vector<240x16xf32>
    %13 = vector.shape_cast %12 : vector<240x16xf32> to vector<10x24x16xf32>
    %c0_6 = arith.constant 0 : index
    %c0_7 = arith.constant 0 : index
    %c0_8 = arith.constant 0 : index
    %14 = vector.load %arg5[%c0_6, %c0_7, %c0_8] : memref<3x3x16xf32, #tpu.memory_space<vmem>>, vector<3x3x16xf32>
    %15 = vector.extract_strided_slice %13 {offsets = [0, 0, 0], sizes = [10, 16, 16], strides = [1, 1, 1]} : vector<10x24x16xf32> to vector<10x16x16xf32>
    %16 = vector.extract_strided_slice %13 {offsets = [0, 1, 0], sizes = [10, 16, 16], strides = [1, 1, 1]} : vector<10x24x16xf32> to vector<10x16x16xf32>
    %17 = vector.extract_strided_slice %13 {offsets = [0, 2, 0], sizes = [10, 16, 16], strides = [1, 1, 1]} : vector<10x24x16xf32> to vector<10x16x16xf32>
    %cst_9 = arith.constant 0.000000e+00 : f32
    %18 = vector.broadcast %cst_9 : f32 to vector<8x16x16xf32>
    %19 = vector.extract_strided_slice %15 {offsets = [0, 0, 0], sizes = [8, 16, 16], strides = [1, 1, 1]} : vector<10x16x16xf32> to vector<8x16x16xf32>
    %20 = vector.extract_strided_slice %14 {offsets = [0, 0, 0], sizes = [1, 1, 16], strides = [1, 1, 1]} : vector<3x3x16xf32> to vector<1x1x16xf32>
    %21 = vector.shape_cast %20 : vector<1x1x16xf32> to vector<16xf32>
    %22 = vector.shape_cast %21 : vector<16xf32> to vector<1x1x16xf32>
    %23 = vector.broadcast %22 : vector<1x1x16xf32> to vector<8x16x16xf32>
    %24 = arith.mulf %19, %23 : vector<8x16x16xf32>
    %25 = arith.addf %18, %24 : vector<8x16x16xf32>
    %26 = vector.extract_strided_slice %16 {offsets = [0, 0, 0], sizes = [8, 16, 16], strides = [1, 1, 1]} : vector<10x16x16xf32> to vector<8x16x16xf32>
    %27 = vector.extract_strided_slice %14 {offsets = [0, 1, 0], sizes = [1, 1, 16], strides = [1, 1, 1]} : vector<3x3x16xf32> to vector<1x1x16xf32>
    %28 = vector.shape_cast %27 : vector<1x1x16xf32> to vector<16xf32>
    %29 = vector.shape_cast %28 : vector<16xf32> to vector<1x1x16xf32>
    %30 = vector.broadcast %29 : vector<1x1x16xf32> to vector<8x16x16xf32>
    %31 = arith.mulf %26, %30 : vector<8x16x16xf32>
    %32 = arith.addf %25, %31 : vector<8x16x16xf32>
    %33 = vector.extract_strided_slice %17 {offsets = [0, 0, 0], sizes = [8, 16, 16], strides = [1, 1, 1]} : vector<10x16x16xf32> to vector<8x16x16xf32>
    %34 = vector.extract_strided_slice %14 {offsets = [0, 2, 0], sizes = [1, 1, 16], strides = [1, 1, 1]} : vector<3x3x16xf32> to vector<1x1x16xf32>
    %35 = vector.shape_cast %34 : vector<1x1x16xf32> to vector<16xf32>
    %36 = vector.shape_cast %35 : vector<16xf32> to vector<1x1x16xf32>
    %37 = vector.broadcast %36 : vector<1x1x16xf32> to vector<8x16x16xf32>
    %38 = arith.mulf %33, %37 : vector<8x16x16xf32>
    %39 = arith.addf %32, %38 : vector<8x16x16xf32>
    %40 = vector.extract_strided_slice %15 {offsets = [1, 0, 0], sizes = [8, 16, 16], strides = [1, 1, 1]} : vector<10x16x16xf32> to vector<8x16x16xf32>
    %41 = vector.extract_strided_slice %14 {offsets = [1, 0, 0], sizes = [1, 1, 16], strides = [1, 1, 1]} : vector<3x3x16xf32> to vector<1x1x16xf32>
    %42 = vector.shape_cast %41 : vector<1x1x16xf32> to vector<16xf32>
    %43 = vector.shape_cast %42 : vector<16xf32> to vector<1x1x16xf32>
    %44 = vector.broadcast %43 : vector<1x1x16xf32> to vector<8x16x16xf32>
    %45 = arith.mulf %40, %44 : vector<8x16x16xf32>
    %46 = arith.addf %39, %45 : vector<8x16x16xf32>
    %47 = vector.extract_strided_slice %16 {offsets = [1, 0, 0], sizes = [8, 16, 16], strides = [1, 1, 1]} : vector<10x16x16xf32> to vector<8x16x16xf32>
    %48 = vector.extract_strided_slice %14 {offsets = [1, 1, 0], sizes = [1, 1, 16], strides = [1, 1, 1]} : vector<3x3x16xf32> to vector<1x1x16xf32>
    %49 = vector.shape_cast %48 : vector<1x1x16xf32> to vector<16xf32>
    %50 = vector.shape_cast %49 : vector<16xf32> to vector<1x1x16xf32>
    %51 = vector.broadcast %50 : vector<1x1x16xf32> to vector<8x16x16xf32>
    %52 = arith.mulf %47, %51 : vector<8x16x16xf32>
    %53 = arith.addf %46, %52 : vector<8x16x16xf32>
    %54 = vector.extract_strided_slice %17 {offsets = [1, 0, 0], sizes = [8, 16, 16], strides = [1, 1, 1]} : vector<10x16x16xf32> to vector<8x16x16xf32>
    %55 = vector.extract_strided_slice %14 {offsets = [1, 2, 0], sizes = [1, 1, 16], strides = [1, 1, 1]} : vector<3x3x16xf32> to vector<1x1x16xf32>
    %56 = vector.shape_cast %55 : vector<1x1x16xf32> to vector<16xf32>
    %57 = vector.shape_cast %56 : vector<16xf32> to vector<1x1x16xf32>
    %58 = vector.broadcast %57 : vector<1x1x16xf32> to vector<8x16x16xf32>
    %59 = arith.mulf %54, %58 : vector<8x16x16xf32>
    %60 = arith.addf %53, %59 : vector<8x16x16xf32>
    %61 = vector.extract_strided_slice %15 {offsets = [2, 0, 0], sizes = [8, 16, 16], strides = [1, 1, 1]} : vector<10x16x16xf32> to vector<8x16x16xf32>
    %62 = vector.extract_strided_slice %14 {offsets = [2, 0, 0], sizes = [1, 1, 16], strides = [1, 1, 1]} : vector<3x3x16xf32> to vector<1x1x16xf32>
    %63 = vector.shape_cast %62 : vector<1x1x16xf32> to vector<16xf32>
    %64 = vector.shape_cast %63 : vector<16xf32> to vector<1x1x16xf32>
    %65 = vector.broadcast %64 : vector<1x1x16xf32> to vector<8x16x16xf32>
    %66 = arith.mulf %61, %65 : vector<8x16x16xf32>
    %67 = arith.addf %60, %66 : vector<8x16x16xf32>
    %68 = vector.extract_strided_slice %16 {offsets = [2, 0, 0], sizes = [8, 16, 16], strides = [1, 1, 1]} : vector<10x16x16xf32> to vector<8x16x16xf32>
    %69 = vector.extract_strided_slice %14 {offsets = [2, 1, 0], sizes = [1, 1, 16], strides = [1, 1, 1]} : vector<3x3x16xf32> to vector<1x1x16xf32>
    %70 = vector.shape_cast %69 : vector<1x1x16xf32> to vector<16xf32>
    %71 = vector.shape_cast %70 : vector<16xf32> to vector<1x1x16xf32>
    %72 = vector.broadcast %71 : vector<1x1x16xf32> to vector<8x16x16xf32>
    %73 = arith.mulf %68, %72 : vector<8x16x16xf32>
    %74 = arith.addf %67, %73 : vector<8x16x16xf32>
    %75 = vector.extract_strided_slice %17 {offsets = [2, 0, 0], sizes = [8, 16, 16], strides = [1, 1, 1]} : vector<10x16x16xf32> to vector<8x16x16xf32>
    %76 = vector.extract_strided_slice %14 {offsets = [2, 2, 0], sizes = [1, 1, 16], strides = [1, 1, 1]} : vector<3x3x16xf32> to vector<1x1x16xf32>
    %77 = vector.shape_cast %76 : vector<1x1x16xf32> to vector<16xf32>
    %78 = vector.shape_cast %77 : vector<16xf32> to vector<1x1x16xf32>
    %79 = vector.broadcast %78 : vector<1x1x16xf32> to vector<8x16x16xf32>
    %80 = arith.mulf %75, %79 : vector<8x16x16xf32>
    %81 = arith.addf %74, %80 : vector<8x16x16xf32>
    %c0_10 = arith.constant 0 : index
    %c0_11 = arith.constant 0 : index
    %82 = vector.load %arg6[%c0_10, %c0_11] : memref<1x16xf32, #tpu.memory_space<vmem>>, vector<1x16xf32>
    %83 = vector.shape_cast %82 : vector<1x16xf32> to vector<1x1x16xf32>
    %84 = vector.broadcast %83 : vector<1x1x16xf32> to vector<8x16x16xf32>
    %85 = arith.addf %81, %84 : vector<8x16x16xf32>
    %cst_12 = arith.constant 0.000000e+00 : f32
    %cst_13 = arith.constant 6.000000e+00 : f32
    %86 = vector.broadcast %cst_12 : f32 to vector<8x16x16xf32>
    %87 = arith.maximumf %86, %85 : vector<8x16x16xf32>
    %88 = vector.broadcast %cst_13 : f32 to vector<8x16x16xf32>
    %89 = arith.minimumf %88, %87 : vector<8x16x16xf32>
    %90 = vector.shape_cast %89 : vector<8x16x16xf32> to vector<128x16xf32>
    %91 = arith.truncf %90 : vector<128x16xf32> to vector<128x16xbf16>
    %c0_14 = arith.constant 0 : index
    %c0_15 = arith.constant 0 : index
    %92 = vector.load %arg7[%c0_14, %c0_15] : memref<4x16xbf16, #tpu.memory_space<vmem>>, vector<4x16xbf16>
    %93 = tpu.transpose %91, [1, 0] : vector<128x16xbf16> -> vector<16x128xbf16>
    %cst_16 = arith.constant dense<0.000000e+00> : vector<4x128xf32>
    %94 = tpu.matmul %92, %93, %cst_16 {dimension_numbers = #tpu.dot_dimension_numbers<[1], [0], [0], [1], [0, 0, 1, 1], [], []>} : vector<4x16xbf16>, vector<16x128xbf16>, vector<4x128xf32> -> vector<4x128xf32>
    %c0_17 = arith.constant 0 : index
    %c0_18 = arith.constant 0 : index
    %95 = vector.load %arg8[%c0_17, %c0_18] : memref<4x1xf32, #tpu.memory_space<vmem>>, vector<4x1xf32>
    %96 = vector.broadcast %95 : vector<4x1xf32> to vector<4x128xf32>
    %97 = arith.addf %94, %96 : vector<4x128xf32>
    %c0_19 = arith.constant 0 : index
    %c0_20 = arith.constant 0 : index
    %c0_21 = arith.constant 0 : index
    %98 = vector.load %arg3[%c0_19, %c0_20, %c0_21] : memref<1x4x128xf32, #tpu.memory_space<vmem>>, vector<1x4x128xf32>
    %99 = vector.shape_cast %98 : vector<1x4x128xf32> to vector<4x128xf32>
    %100 = arith.addf %97, %99 : vector<4x128xf32>
    %c0_22 = arith.constant 0 : index
    %c0_23 = arith.constant 0 : index
    %c0_24 = arith.constant 0 : index
    %101 = vector.load %arg9[%c0_22, %c0_23, %c0_24] : memref<1x4x128xf32, #tpu.memory_space<vmem>>, vector<1x4x128xf32>
    %102 = vector.shape_cast %101 : vector<1x4x128xf32> to vector<4x128xf32>
    %103 = vector.shape_cast %100 : vector<4x128xf32> to vector<1x4x128xf32>
    tpu.vector_store %arg9[%c0_22, %c0_23, %c0_24], %103 {strides = array<i32>} : memref<1x4x128xf32, #tpu.memory_space<vmem>>, vector<1x4x128xf32>,
    return
  }
  func.func @transform_0(%arg0: i32, %arg1: i32) -> (i32, i32, i32, i32) {
    %c0_i32 = arith.constant 0 : i32
    %c0_i32_0 = arith.constant 0 : i32
    %c0_i32_1 = arith.constant 0 : i32
    %c0_i32_2 = arith.constant 0 : i32
    return %arg0, %c0_i32, %c0_i32_0, %c0_i32_1 : i32, i32, i32, i32
  }
  func.func @transform_1(%arg0: i32, %arg1: i32) -> (i32, i32, i32) {
    %c0_i32 = arith.constant 0 : i32
    %c0_i32_0 = arith.constant 0 : i32
    return %arg0, %c0_i32, %arg1 : i32, i32, i32
  }
  func.func @transform_2(%arg0: i32, %arg1: i32) -> (i32, i32) {
    %c0_i32 = arith.constant 0 : i32
    %c0_i32_0 = arith.constant 0 : i32
    %c0_i32_1 = arith.constant 0 : i32
    return %c0_i32, %c0_i32_0 : i32, i32
  }
  func.func @transform_3(%arg0: i32, %arg1: i32) -> (i32, i32, i32) {
    %c0_i32 = arith.constant 0 : i32
    %c0_i32_0 = arith.constant 0 : i32
    %c0_i32_1 = arith.constant 0 : i32
    %c0_i32_2 = arith.constant 0 : i32
    return %c0_i32, %c0_i32_0, %c0_i32_1 : i32, i32, i32
  }
  func.func @transform_4(%arg0: i32, %arg1: i32) -> (i32, i32) {
    %c0_i32 = arith.constant 0 : i32
    %c0_i32_0 = arith.constant 0 : i32
    %c0_i32_1 = arith.constant 0 : i32
    return %c0_i32, %c0_i32_0 : i32, i32
  }
  func.func @transform_5(%arg0: i32, %arg1: i32) -> (i32, i32) {
    %c0_i32 = arith.constant 0 : i32
    %c0_i32_0 = arith.constant 0 : i32
    %c0_i32_1 = arith.constant 0 : i32
    return %c0_i32, %c0_i32_0 : i32, i32
  }
  func.func @transform_6(%arg0: i32, %arg1: i32) -> (i32, i32) {
    %c0_i32 = arith.constant 0 : i32
    %c0_i32_0 = arith.constant 0 : i32
    %c0_i32_1 = arith.constant 0 : i32
    return %c0_i32, %c0_i32_0 : i32, i32
  }
  func.func @transform_7(%arg0: i32, %arg1: i32) -> (i32, i32, i32) {
    %c0_i32 = arith.constant 0 : i32
    %c0_i32_0 = arith.constant 0 : i32
    return %arg0, %c0_i32, %arg1 : i32, i32, i32
  }
}

</mosaic_0001>

<bundles_post_ra>
// kernel: tpu_custom_call.1
= control target key start
LH: loop header
LB: loop body
LE: loop exit
PB: predicated region body
PF: predicated region fallthrough
CT: control target
= control target key end

     0   :  { %s3043_s0 = inlined_call_operand.vmem [shape: f32[2,18,24,5], index: 0, kind: input, shape index: {}]   ;;  %s3044_s1 = inlined_call_operand.vmem [shape: f32[2,4,256], index: 1, kind: input, shape index: {}]   ;;  %s3045_s2 = inlined_call_operand.vmem [shape: bf16[5,16], index: 2, kind: input, shape index: {}]   ;;  %s3046_s3 = inlined_call_operand.vmem [shape: f32[3,3,16], index: 3, kind: input, shape index: {}]   ;;  %s3047_s4 = inlined_call_operand.vmem [shape: f32[1,16], index: 4, kind: input, shape index: {}]   ;;  %s3048_s5 = inlined_call_operand.vmem [shape: bf16[4,16], index: 5, kind: input, shape index: {}]   ;;  %s3049_s6 = inlined_call_operand.vmem [shape: f32[4,1], index: 6, kind: input, shape index: {}]   ;;  %s3050_s7 = inlined_call_operand.hbm [shape: f32[2,4,256], index: 7, kind: output, shape index: {}]  }
   0x1   :  { %3053 = sst [smem:[#allocation5_spill]] %s3043_s0 }
   0x2   :  { %3054 = sst [smem:[#allocation6_spill]] %s3045_s2 }
   0x3   :  { %3055 = sst [smem:[#allocation7_spill]] %s3046_s3 }
   0x4   :  { %3056 = sst [smem:[#allocation8_spill]] %s3047_s4 }
   0x5   :  { %3057 = sst [smem:[#allocation9_spill]] %s3048_s5 }
   0x6   :  { %12 = vsyncpa [#allocation3], 0 }
   0x7   :  { %14 = vsyncpa [#allocation3 + $0x1], 0  ;;  %s2103_s24 = smov 0   ;;  %s2105_s25 = smov 0  }
   0x8   :  { %s2107_s26 = smov 0   ;;  %s2109_s27 = smov 0  }
   0x9   :  { %s2111_s28 = smov 0   ;;  %s2113_s29 = smov 0  }
   0xa   :  { %s2115_s30 = smov 0   ;;  %s2117_s8 = smov 0  }
   0xb LB: > { %s1744_s9 = sadd.s32 4294967295, %s2056_s8   ;;  %s1745_s10 = sadd.s32 4294967294, %s2056_s8   ;;  %s2056_s8 = sphi %s2117_s8, %s20_s8   ;;  %s2052_s30 = sphi %s2115_s30, %s3083_s30   ;;  %s2048_s29 = sphi %s2113_s29, %s3082_s29   ;;  %s2044_s28 = sphi %s2111_s28, %s3081_s28   ;;  %s2040_s27 = sphi %s2109_s27, %s3080_s27   ;;  %s2036_s26 = sphi %s2107_s26, %s3079_s26   ;;  %s2032_s25 = sphi %s2105_s25, %s3078_s25   ;;  %s2028_s24 = sphi %s2103_s24, %s3077_s24  }
   0xc   : > { %s29_s11 = sadd.s32 1, %s2048_s29  ;;  %s32_s12 = sadd.s32 1, %s2052_s30 }
   0xd   : > { %p30_p0 = scmp.ge.s32.totalorder %s29_s11, 2  ;;  %p210_p1 = scmp.ne.s32.totalorder %s2036_s26, %s2032_s25 }
   0xe   : > { %p211_p2 = scmp.eq.s32.totalorder %s1744_s9, 3  ;;  %p216_p5 = scmp.ne.s32.totalorder %s2032_s25, %s2028_s24 }
   0xf   : > { %s3085_s11 = smov (%p30_p0, %s29_s11), 0  ;;  %s3087_s12 = smov (!%p30_p0, %s32_s12), %s2052_s30 }
  0x10   : > { %s196_s13 = ssub.s32 %s2048_s29, %s3085_s11  ;;  %p2154_p3 = por %p211_p2, %p210_p1 }
  0x11   : > { %p34_p4 = scmp.ge.s32.totalorder %s3087_s12, 2  ;;  %p217_p6 = scmp.eq.s32.totalorder %s1745_s10, 3 }
  0x12   : > { %p1748_p7 = scmp.ge.s32.totalorder %s2056_s8, 1  ;;  %p269_p9 = scmp.lt.s32.totalorder %s2056_s8, 5 }
  0x13   : > { %s3089_s12 = smov (%p34_p4, %s3087_s12), 0  ;;  %p2163_p8 = por %p217_p6, %p216_p5 }
  0x14   : > { %s195_s16 = ssub.s32 %s2052_s30, %s3089_s12  ;;  %s200_s17 = sadd.s32 1, %s2036_s26 }
  0x15   : > { %s197_s18 = sor.u32 %s196_s13, %s195_s16  ;;  %p270_p10 = pnand %p1748_p7, %p269_p9 }
  0x16   : > { %p198_p11 = scmp.eq.s32.totalorder %s197_s18, 0  ;;  %s3060_s2 = sld [smem:[#allocation6_spill]] (!%p270_p10)  ;;  %vm418_vm0 = vcmask (!%p270_p10), 1041408   ;;  %vm419_vm1 = vcmask (!%p270_p10), 1042432   ;;  %v3051_v1 = vmov (!%p270_p10), 0.0   ;;  %v2059_v2 = vmov (!%p270_p10), 65535  }
  0x17   : > { %273 = sbr.rel (%p270_p10) target bundleno = 686 (0x2ae), region = 48  ;;  %1802 = vmatprep.subr.bf16.mxu0 (!%p270_p10), %v3051_v1  ;;  %v420_v3 = vsel (!%p270_p10), %vm418_vm0, 4294967295, %v2059_v2  ;;  %p309_p12 = scmp.lt.s32.totalorder (!%p270_p10), %s2044_s28, 1  ;;  %1864 = vmatprep.subr.bf16.mxu1 (!%p270_p10), %v3051_v1  ;;  %vm2060_vm2 = vmmov (!%p270_p10), 0   ;;  %vm372_vm3 = vcmask (!%p270_p10), 39936   ;;  %v641_v51 = vlaneseq (!%p270_p10) }
  0x18   : > { %s2172_s19 = scalar_select %p198_p11, %s2036_s26, %s200_s17  }
  0x19   : > { %v421_v4 = vsel (!%p270_p10), %vm419_vm1, %v420_v3, 0  ;;  %1804 = vmatprep.mubr.msk.bf16.mxu0 (!%p270_p10), %vm2060_vm2, %v3051_v1  ;;  %1880 = vmatprep.mubr.msk.bf16.mxu1 (!%p270_p10), %vm2060_vm2, %v3051_v1  ;;  %s1754_s23 = smul.u32 (!%p270_p10), 192, %s2040_s27  ;;  %s3061_s0 = sld [smem:[#allocation5_spill]] (!%p270_p10)  ;;  %v642_v52 = vshrl.u32 (!%p270_p10), %v641_v51, 7  ;;  %vm729_vm4 = vcmask (!%p270_p10), 1046528   ;;  %vm854_vm5 = vcmask (!%p270_p10), 1045504  }
  0x1a   : > { %s3062_s3 = sld [smem:[#allocation7_spill]] (!%p270_p10)  ;;  %s3063_s4 = sld [smem:[#allocation8_spill]] (!%p270_p10)  ;;  %vm1565_vm6 = vcmask (!%p270_p10), 130048  }
  0x1b   : > { %v679_v53 = vsub.s32 (!%p270_p10), 1, %v642_v52  ;;  %v2270_v55 = vsub.s32 (!%p270_p10), 2, %v642_v52  ;;  %v643_v60 = vsub.s32 (!%p270_p10), 0, %v642_v52  ;;  %s3076_s5 = sld [smem:[#allocation9_spill]] (!%p270_p10)  ;;  %p316_p13 = scmp.lt.s32.totalorder (!%p270_p10), %s2040_s27, 1 }
  0x1c   : > { %v371_v0 = vld [vmem:[%s3060_s2] sm:$0x7] (!%p270_p10)  ;;  %s1773_s21 = sshll.u32 (!%p270_p10), %s2044_s28, 1 }
  0x1d   : > { %v423_v5 = vand.u32 (!%p270_p10), %v421_v4, %v371_v0 }
  0x1e   : > { %s2185_s22 = scalar_select %p309_p12, %s2044_s28, 1 }
  0x1f   : > { %1803 = vmatpush3.bf16.msra.mxu0 %v423_v5  ;;  %s317_s10 = scalar_select %p316_p13, %s2040_s27, 1 }
  0x20   : > { %s1884_s9 = smul.u32 432, %s2185_s22  ;;  %v638_v54 = vld [vmem:[%s3062_s3] sm:$0x7]  ;;  %s1751_s13 = sshll.u32 %s2185_s22, 1 }
  0x21   : > { %v2272_v58 = vrot.slane %v638_v54, %v679_v53  ;;  %v2275_v61 = vrot.slane %v638_v54, %v2270_v55  ;;  %v2278_v5 = vrot.slane %v638_v54, %v643_v60 }
  0x22   : > { %s313_s16 = scalar_lea.vmem %s3061_s0, %s1884_s9 }
  0x23   : > { %s2192_s17 = scalar_lea.vmem %s313_s16, %s1754_s23  ;;  %s319_s16 = sadd.s32 %s1751_s13, %s317_s10 }
  0x24   : > { %v326_v6 = vld [vmem:[%s2192_s17] sm:$0xff]  ;;  %v327_v7 = vld [vmem:[%s2192_s17 + $0x8] sm:$0xff]  ;;  %v328_v9 = vld [vmem:[%s2192_s17 + $0x10] sm:$0xff]  ;;  %s1752_s18 = sshll.u32 %s319_s16, 2 }
  0x25   : > { %v356_v8 = vpack.c.bf16 %v327_v7, %v326_v6  ;;  %v329_v10 = vld [vmem:[%s2192_s17 + $0x18] sm:$0xff]  ;;  %v330_v12 = vld [vmem:[%s2192_s17 + $0x20] sm:$0xff]  ;;  %v331_v13 = vld [vmem:[%s2192_s17 + $0x28] sm:$0xff] }
  0x26   : > { %v357_v11 = vpack.c.bf16 %v329_v10, %v328_v9  ;;  %v358_v14 = vpack.c.bf16 %v331_v13, %v330_v12  ;;  %v332_v15 = vld [vmem:[%s2192_s17 + $0x30] sm:$0xff]  ;;  %v333_v16 = vld [vmem:[%s2192_s17 + $0x38] sm:$0xff]  ;;  %v334_v18 = vld [vmem:[%s2192_s17 + $0x40] sm:$0xff] }
  0x27   : > { %1805 = vmatmul.mubr.msk.bf16.vlgmr.msra.gmra.mrb[0].mxu0 %vm372_vm3, %v356_v8  ;;  %v359_v17 = vpack.c.bf16 %v333_v16, %v332_v15  ;;  %v335_v19 = vld [vmem:[%s2192_s17 + $0x48] sm:$0xff]  ;;  %v336_v21 = vld [vmem:[%s2192_s17 + $0x50] sm:$0xff]  ;;  %v337_v22 = vld [vmem:[%s2192_s17 + $0x58] sm:$0xff] }
  0x28   : > { %1808 = vmatprep.mubr.msk.bf16.mxu0 %vm2060_vm2, %v3051_v1  ;;  %v360_v20 = vpack.c.bf16 %v335_v19, %v334_v18  ;;  %v361_v23 = vpack.c.bf16 %v337_v22, %v336_v21  ;;  %v338_v24 = vld [vmem:[%s2192_s17 + $0x60] sm:$0xff]  ;;  %v339_v25 = vld [vmem:[%s2192_s17 + $0x68] sm:$0xff]  ;;  %v340_v27 = vld [vmem:[%s2192_s17 + $0x70] sm:$0xff] }
  0x29   : > { %v362_v26 = vpack.c.bf16 %v339_v25, %v338_v24  ;;  %v341_v28 = vld [vmem:[%s2192_s17 + $0x78] sm:$0xff]  ;;  %v342_v30 = vld [vmem:[%s2192_s17 + $0x80] sm:$0xff]  ;;  %v343_v31 = vld [vmem:[%s2192_s17 + $0x88] sm:$0xff] }
  0x2a   : > { %v363_v29 = vpack.c.bf16 %v341_v28, %v340_v27  ;;  %v364_v32 = vpack.c.bf16 %v343_v31, %v342_v30  ;;  %v344_v33 = vld [vmem:[%s2192_s17 + $0x90] sm:$0xff]  ;;  %v345_v34 = vld [vmem:[%s2192_s17 + $0x98] sm:$0xff]  ;;  %v346_v36 = vld [vmem:[%s2192_s17 + $0xa0] sm:$0xff] }
  0x2b   : > { %v365_v35 = vpack.c.bf16 %v345_v34, %v344_v33  ;;  %v347_v37 = vld [vmem:[%s2192_s17 + $0xa8] sm:$0xff]  ;;  %v348_v39 = vld [vmem:[%s2192_s17 + $0xb0] sm:$0xff]  ;;  %v349_v40 = vld [vmem:[%s2192_s17 + $0xb8] sm:$0xff] }
  0x2c   : > { %v366_v38 = vpack.c.bf16 %v347_v37, %v346_v36  ;;  %v367_v41 = vpack.c.bf16 %v349_v40, %v348_v39  ;;  %v350_v42 = vld [vmem:[%s2192_s17 + $0xc0] sm:$0xff]  ;;  %v351_v43 = vld [vmem:[%s2192_s17 + $0xc8] sm:$0xff]  ;;  %v352_v45 = vld [vmem:[%s2192_s17 + $0xd0] sm:$0xff] }
  0x2d   : > { %v368_v44 = vpack.c.bf16 %v351_v43, %v350_v42  ;;  %v353_v46 = vld [vmem:[%s2192_s17 + $0xd8] sm:$0xff]  ;;  %v354_v48 = vld [vmem:[%s2192_s17 + $0xe0] sm:$0xff]  ;;  %v355_v49 = vld [vmem:[%s2192_s17 + $0xe8] sm:$0xff]  ;;  %s306_s17 = sand.u32 1, %s2032_s25  }
  0x2e   : > { %v369_v47 = vpack.c.bf16 %v353_v46, %v352_v45  ;;  %v370_v50 = vpack.c.bf16 %v355_v49, %v354_v48  ;;  %v639_v8 = vld [vmem:[%s3062_s3 + $0x4] sm:$0x7]  ;;  %s1749_s20 = sshll.u32 %s306_s17, 2  ;;  %s1637_s0 = scalar_lea.sflag [#allocation3], %s306_s17 }
  0x2f   : > { %1809 = vmatmul.mubr.msk.bf16.gmra.mrb[4].mxu0 %vm372_vm3, %v357_v11  ;;  %v2290_v24 = vrot.slane %v639_v8, %v679_v53  ;;  %v2294_v27 = vrot.slane %v639_v8, %v2270_v55  ;;  %s308_s9 = scalar_lea.vmem [#allocation2], %s1749_s20 }
  0x30   : > { %1812 = vmatprep.mubr.msk.bf16.mxu0 %vm2060_vm2, %v3051_v1 }
  0x37   : > { %1813 = vmatmul.mubr.msk.bf16.gmra.mrb[8].mxu0 %vm372_vm3, %v358_v14 }
  0x38   : > { %1816 = vmatprep.mubr.msk.bf16.mxu0 %vm2060_vm2, %v3051_v1 }
  0x3f   : > { %1817 = vmatmul.mubr.msk.bf16.gmra.mrb[12].mxu0 %vm372_vm3, %v359_v17 }
  0x40   : > { %1820 = vmatprep.mubr.msk.bf16.mxu0 %vm2060_vm2, %v3051_v1 }
  0x47   : > { %1821 = vmatmul.mubr.msk.bf16.gmra.mrb[16].mxu0 %vm372_vm3, %v360_v20 }
  0x48   : > { %1824 = vmatprep.mubr.msk.bf16.mxu0 %vm2060_vm2, %v3051_v1 }
  0x4f   : > { %1825 = vmatmul.mubr.msk.bf16.gmra.mrb[20].mxu0 %vm372_vm3, %v361_v23  ;;  %v2288_v23 = vrot.slane %v639_v8, %v643_v60 }
  0x50   : > { %1828 = vmatprep.mubr.msk.bf16.mxu0 %vm2060_vm2, %v3051_v1 }
  0x57   : > { %1829 = vmatmul.mubr.msk.bf16.gmra.mrb[24].mxu0 %vm372_vm3, %v362_v26 }
  0x58   : > { %1832 = vmatprep.mubr.msk.bf16.mxu0 %vm2060_vm2, %v3051_v1 }
  0x5f   : > { %1833 = vmatmul.mubr.msk.bf16.gmra.mrb[28].mxu0 %vm372_vm3, %v363_v29 }
  0x60   : > { %1836 = vmatprep.mubr.msk.bf16.mxu0 %vm2060_vm2, %v3051_v1 }
  0x67   : > { %1837 = vmatmul.mubr.msk.bf16.gmra.mrb[32].mxu0 %vm372_vm3, %v364_v32 }
  0x68   : > { %1840 = vmatprep.mubr.msk.bf16.mxu0 %vm2060_vm2, %v3051_v1 }
  0x6f   : > { %1841 = vmatmul.mubr.msk.bf16.gmra.mrb[36].mxu0 %vm372_vm3, %v365_v35  ;;  %v640_v35 = vld [vmem:[%s3062_s3 + $0x8] sm:$0x7]  ;;  %s321_s3 = scalar_lea.vmem %s3044_s1, %s1752_s18 }
  0x70   : > { %1844 = vmatprep.mubr.msk.bf16.mxu0 %vm2060_vm2, %v3051_v1  ;;  %v2311_v49 = vrot.slane %v640_v35, %v643_v60 }
  0x77   : > { %1845 = vmatmul.mubr.msk.bf16.gmra.mrb[40].mxu0 %vm372_vm3, %v366_v38 }
  0x78   : > { %1848 = vmatprep.mubr.msk.bf16.mxu0 %vm2060_vm2, %v3051_v1 }
  0x7f   : > { %1849 = vmatmul.mubr.msk.bf16.gmra.mrb[44].mxu0 %vm372_vm3, %v367_v41 }
  0x80   : > { %1852 = vmatprep.mubr.msk.bf16.mxu0 %vm2060_vm2, %v3051_v1 }
  0x87   : > { %1853 = vmatmul.mubr.msk.bf16.gmra.mrb[48].mxu0 %vm372_vm3, %v368_v44 }
  0x88   : > { %1856 = vmatprep.mubr.msk.bf16.mxu0 %vm2060_vm2, %v3051_v1 }
  0x8f   : > { %1857 = vmatmul.mubr.msk.bf16.gmra.mrb[52].mxu0 %vm372_vm3, %v369_v47 }
  0x90   : > { %1860 = vmatprep.mubr.msk.bf16.mxu0 %vm2060_vm2, %v3051_v1 }
  0x97   : > { %1861 = vmatmul.mubr.msk.bf16.gmra.mrb[56].mxu0 %vm372_vm3, %v370_v50  ;;  %v2313_v50 = vrot.slane %v640_v35, %v679_v53 }
  0xfa   : > { %v459_v56 = vpop.f32.mrb[0].mxu0 }
  0xfb   : > { %v578_v57 = vmax.f32 %v459_v56, 0.0  ;;  %v1806_v59 = vpop.f32.mrb[1].mxu0 }
  0xfc   : > { %v462_v62 = vpop.f32.mrb[2].mxu0 }
  0xfd   : > { %v608_v63 = vmin.f32 %v578_v57, 6.0  ;;  %v579_v0 = vmax.f32 %v462_v62, 0.0  ;;  %v1807_v2 = vpop.f32.mrb[3].mxu0  ;;  %v2317_v57 = vrot.slane %v640_v35, %v2270_v55 }
  0xff   : > { %v681_v3 = vmul.f32 %v2272_v58, %v608_v63  ;;  %v609_v4 = vmin.f32 %v579_v0, 6.0  ;;  %v806_v6 = vmul.f32 %v2275_v61, %v608_v63  ;;  %v645_v15 = vmul.f32 %v2278_v5, %v608_v63 }
 0x101   : > { %v682_v7 = vmul.f32 %v2272_v58, %v609_v4  ;;  %v807_v9 = vmul.f32 %v2275_v61, %v609_v4  ;;  %v730_v11 = vrot.slane %v681_v3, 1  ;;  %v855_v16 = vrot.slane %v806_v6, 2 }
 0x102   : > { %v467_v10 = vpop.f32.mrb[4].mxu0  ;;  %v646_v32 = vmul.f32 %v2278_v5, %v609_v4 }
 0x103   : > { %v731_v12 = vrot.slane %v682_v7, 1  ;;  %v580_v13 = vmax.f32 %v467_v10, 0.0  ;;  %v1810_v14 = vpop.f32.mrb[5].mxu0  ;;  %v856_v17 = vrot.slane %v807_v9, 2 }
 0x104   : > { %v470_v18 = vpop.f32.mrb[6].mxu0 }
 0x105   : > { %v732_v19 = vsel %vm729_vm4, %v730_v11, %v731_v12  ;;  %v610_v20 = vmin.f32 %v580_v13, 6.0  ;;  %v581_v21 = vmax.f32 %v470_v18, 0.0  ;;  %v1811_v22 = vpop.f32.mrb[7].mxu0  ;;  %v857_v26 = vsel %vm854_vm5, %v855_v16, %v856_v17 }
 0x106   : > { %v786_v25 = vadd.f32 %v732_v19, %v645_v15 }
 0x107   : > { %v683_v28 = vmul.f32 %v2272_v58, %v610_v20  ;;  %v808_v29 = vmul.f32 %v2275_v61, %v610_v20  ;;  %v611_v30 = vmin.f32 %v581_v21, 6.0 }
 0x108   : > { %v911_v31 = vadd.f32 %v857_v26, %v786_v25 }
 0x109   : > { %v733_v33 = vrot.slane %v683_v28, 1  ;;  %v858_v34 = vrot.slane %v808_v29, 2  ;;  %v684_v36 = vmul.f32 %v2272_v58, %v611_v30  ;;  %v2304_v37 = vmul.f32 %v2275_v61, %v611_v30 }
 0x10a   : > { %v931_v38 = vmul.f32 %v2288_v23, %v611_v30  ;;  %v967_v39 = vmul.f32 %v2290_v24, %v611_v30  ;;  %v475_v40 = vpop.f32.mrb[8].mxu0  ;;  %v1091_v43 = vmul.f32 %v2294_v27, %v611_v30  ;;  %v647_v51 = vmul.f32 %v2278_v5, %v611_v30 }
 0x10b   : > { %v734_v41 = vsel %vm729_vm4, %v731_v12, %v733_v33  ;;  %v859_v42 = vsel %vm854_vm5, %v856_v17, %v858_v34  ;;  %v582_v44 = vmax.f32 %v475_v40, 0.0  ;;  %v1814_v45 = vpop.f32.mrb[9].mxu0  ;;  %v735_v62 = vrot.slane %v684_v36, 1 }
 0x10c   : > { %v787_v46 = vadd.f32 %v734_v41, %v646_v32  ;;  %v478_v47 = vpop.f32.mrb[10].mxu0  ;;  %v947_v48 = vadd.f32 %v931_v38, %v911_v31  ;;  %v860_v63 = vrot.slane %v2304_v37, 2  ;;  %v1015_v0 = vrot.slane %v967_v39, 1 }
 0x10d   : > { %v612_v52 = vmin.f32 %v582_v44, 6.0  ;;  %v583_v54 = vmax.f32 %v478_v47, 0.0  ;;  %v1815_v56 = vpop.f32.mrb[11].mxu0  ;;  %v1139_v53 = vrot.slane %v1091_v43, 2 }
 0x10e   : > { %v912_v59 = vadd.f32 %v859_v42, %v787_v46 }
 0x10f   : > { %v613_v2 = vmin.f32 %v583_v54, 6.0  ;;  %v685_v3 = vmul.f32 %v2272_v58, %v612_v52  ;;  %v810_v60 = vmul.f32 %v2275_v61, %v612_v52  ;;  %v648_v4 = vmul.f32 %v2278_v5, %v612_v52 }
 0x110   : > { %v932_v6 = vmul.f32 %v2288_v23, %v612_v52  ;;  %v968_v7 = vmul.f32 %v2290_v24, %v612_v52  ;;  %v1092_v55 = vmul.f32 %v2294_v27, %v612_v52 }
 0x111   : > { %v686_v8 = vmul.f32 %v2272_v58, %v613_v2  ;;  %v736_v9 = vrot.slane %v685_v3, 1  ;;  %v811_v10 = vmul.f32 %v2275_v61, %v613_v2  ;;  %v861_v11 = vrot.slane %v810_v60, 2 }
 0x112   : > { %v948_v12 = vadd.f32 %v932_v6, %v912_v59  ;;  %v969_v13 = vmul.f32 %v2290_v24, %v613_v2  ;;  %v1016_v14 = vrot.slane %v968_v7, 1  ;;  %v1093_v15 = vmul.f32 %v2294_v27, %v613_v2  ;;  %v483_v16 = vpop.f32.mrb[12].mxu0 }
 0x113   : > { %v737_v17 = vsel %vm729_vm4, %v735_v62, %v736_v9  ;;  %v738_v18 = vrot.slane %v686_v8, 1  ;;  %v863_v19 = vrot.slane %v811_v10, 2  ;;  %v1140_v20 = vrot.slane %v1092_v55, 2  ;;  %v1818_v21 = vpop.f32.mrb[13].mxu0 }
 0x114   : > { %v1018_v22 = vrot.slane %v969_v13, 1  ;;  %v1142_v25 = vrot.slane %v1093_v15, 2  ;;  %v584_v26 = vmax.f32 %v483_v16, 0.0  ;;  %v486_v28 = vpop.f32.mrb[14].mxu0  ;;  %v1017_v29 = vsel %vm729_vm4, %v1015_v0, %v1016_v14 }
 0x115   : > { %v739_v30 = vsel %vm729_vm4, %v736_v9, %v738_v18  ;;  %v864_v31 = vsel %vm854_vm5, %v861_v11, %v863_v19  ;;  %v585_v32 = vmax.f32 %v486_v28, 0.0  ;;  %v1819_v33 = vpop.f32.mrb[15].mxu0  ;;  %v1071_v34 = vadd.f32 %v1017_v29, %v947_v48 }
 0x116   : > { %v789_v35 = vadd.f32 %v739_v30, %v648_v4  ;;  %v1019_v36 = vsel %vm729_vm4, %v1016_v14, %v1018_v22  ;;  %v1143_v37 = vsel %vm854_vm5, %v1140_v20, %v1142_v25  ;;  %v2336_v38 = vmin.f32 %v584_v26, 6.0  ;;  %v2373_v22 = vld [vmem:[%s3063_s4] ss:$0 sm:$0xff] }
 0x117   : > { %v1072_v39 = vadd.f32 %v1019_v36, %v948_v12  ;;  %v2338_v40 = vmin.f32 %v585_v32, 6.0  ;;  %v1141_v41 = vsel %vm854_vm5, %v1139_v53, %v1140_v20  ;;  %v788_v42 = vadd.f32 %v737_v17, %v647_v51 }
 0x118   : > { %v914_v43 = vadd.f32 %v864_v31, %v789_v35  ;;  %v1195_v44 = vadd.f32 %v1141_v41, %v1071_v34  ;;  %v1215_v45 = vmul.f32 %v2311_v49, %v2336_v38  ;;  %v1251_v46 = vmul.f32 %v2313_v50, %v2336_v38 }
 0x119   : > { %v1196_v47 = vadd.f32 %v1143_v37, %v1072_v39  ;;  %v1216_v48 = vmul.f32 %v2311_v49, %v2338_v40  ;;  %v1252_v52 = vmul.f32 %v2313_v50, %v2338_v40  ;;  %v1375_v54 = vmul.f32 %v2317_v57, %v2336_v38 }
 0x11a   : > { %v491_v56 = vpop.f32.mrb[16].mxu0  ;;  %v1231_v51 = vadd.f32 %v1215_v45, %v1195_v44  ;;  %v1299_v59 = vrot.slane %v1251_v46, 1  ;;  %v1376_v62 = vmul.f32 %v2317_v57, %v2338_v40  ;;  %v862_v0 = vsel %vm854_vm5, %v860_v63, %v861_v11 }
 0x11b   : > { %v586_v2 = vmax.f32 %v491_v56, 0.0  ;;  %v1822_v3 = vpop.f32.mrb[17].mxu0  ;;  %v1232_v60 = vadd.f32 %v1216_v48, %v1196_v47  ;;  %v1300_v53 = vrot.slane %v1252_v52, 1  ;;  %v1423_v4 = vrot.slane %v1375_v54, 2 }
 0x11c   : > { %v494_v6 = vpop.f32.mrb[18].mxu0  ;;  %v1424_v7 = vrot.slane %v1376_v62, 2  ;;  %v913_v55 = vadd.f32 %v862_v0, %v788_v42  ;;  %v933_v8 = vmul.f32 %v2288_v23, %v2336_v38  ;;  %v934_v9 = vmul.f32 %v2288_v23, %v2338_v40 }
 0x11d   : > { %v616_v10 = vmin.f32 %v586_v2, 6.0  ;;  %v587_v12 = vmax.f32 %v494_v6, 0.0  ;;  %v1823_v13 = vpop.f32.mrb[19].mxu0  ;;  %v1301_v14 = vsel %vm729_vm4, %v1299_v59, %v1300_v53  ;;  %v970_v63 = vmul.f32 %v2290_v24, %v2336_v38 }
 0x11e   : > { %v1355_v11 = vadd.f32 %v1301_v14, %v1231_v51  ;;  %v1425_v15 = vsel %vm854_vm5, %v1423_v4, %v1424_v7  ;;  %v949_v16 = vadd.f32 %v933_v8, %v913_v55  ;;  %v950_v17 = vadd.f32 %v934_v9, %v914_v43 }
 0x11f   : > { %v2363_v18 = vmul.f32 %v2272_v58, %v616_v10  ;;  %v2366_v19 = vmul.f32 %v2275_v61, %v616_v10  ;;  %v972_v20 = vmul.f32 %v2290_v24, %v616_v10  ;;  %v1096_v21 = vmul.f32 %v2294_v27, %v616_v10 }
 0x120   : > { %v2375_v25 = vmin.f32 %v587_v12, 6.0  ;;  %v1253_v26 = vmul.f32 %v2313_v50, %v616_v10  ;;  %v1377_v28 = vmul.f32 %v2317_v57, %v616_v10  ;;  %v1479_v29 = vadd.f32 %v1425_v15, %v1355_v11 }
 0x121   : > { %v743_v30 = vrot.slane %v2363_v18, 1  ;;  %v868_v31 = vrot.slane %v2366_v19, 2  ;;  %v1023_v32 = vrot.slane %v972_v20, 1  ;;  %v1147_v33 = vrot.slane %v1096_v21, 2 }
 0x122   : > { %v499_v34 = vpop.f32.mrb[20].mxu0  ;;  %v1302_v35 = vrot.slane %v1253_v26, 1  ;;  %v1426_v36 = vrot.slane %v1377_v28, 2  ;;  %v1502_v37 = vadd.f32 %v2373_v22, %v1479_v29  ;;  %v971_v39 = vmul.f32 %v2290_v24, %v2338_v40 }
 0x123   : > { %v588_v41 = vmax.f32 %v499_v34, 0.0  ;;  %v1826_v42 = vpop.f32.mrb[21].mxu0  ;;  %v1020_v43 = vrot.slane %v970_v63, 1  ;;  %v1094_v44 = vmul.f32 %v2294_v27, %v2336_v38  ;;  %v1095_v45 = vmul.f32 %v2294_v27, %v2338_v40 }
 0x124   : > { %v502_v46 = vpop.f32.mrb[22].mxu0  ;;  %v1303_v47 = vsel %vm729_vm4, %v1300_v53, %v1302_v35  ;;  %v1427_v48 = vsel %vm854_vm5, %v1424_v7, %v1426_v36  ;;  %v1518_v52 = vmax.f32 %v1502_v37, 0.0  ;;  %v1021_v54 = vrot.slane %v971_v39, 1 }
 0x125   : > { %v2390_v56 = vmin.f32 %v588_v41, 6.0  ;;  %v589_v51 = vmax.f32 %v502_v46, 0.0  ;;  %v1827_v59 = vpop.f32.mrb[23].mxu0  ;;  %v1356_v62 = vadd.f32 %v1303_v47, %v1232_v60  ;;  %v1144_v0 = vrot.slane %v1094_v44, 2 }
 0x126   : > { %v1534_v2 = vmin.f32 %v1518_v52, 6.0  ;;  %v1022_v3 = vsel %vm729_vm4, %v1020_v43, %v1021_v54  ;;  %v1024_v4 = vsel %vm729_vm4, %v1021_v54, %v1023_v32  ;;  %v1145_v6 = vrot.slane %v1095_v45, 2 }
 0x127   : > { %v619_v55 = vmin.f32 %v589_v51, 6.0  ;;  %v1480_v8 = vadd.f32 %v1427_v48, %v1356_v62  ;;  %v1073_v53 = vadd.f32 %v1022_v3, %v949_v16  ;;  %v1074_v9 = vadd.f32 %v1024_v4, %v950_v17 }
 0x128   : > { %v1146_v7 = vsel %vm854_vm5, %v1144_v0, %v1145_v6  ;;  %v1148_v10 = vsel %vm854_vm5, %v1145_v6, %v1147_v33  ;;  %v1217_v12 = vmul.f32 %v2311_v49, %v2375_v25  ;;  %v1218_v60 = vmul.f32 %v2311_v49, %v2390_v56 }
 0x129   : > { %v2401_v13 = vmul.f32 %v2272_v58, %v619_v55  ;;  %v2404_v14 = vmul.f32 %v2275_v61, %v619_v55  ;;  %v2407_v63 = vmul.f32 %v2290_v24, %v619_v55  ;;  %v2410_v11 = vmul.f32 %v2294_v27, %v619_v55 }
 0x12a   : > { %v507_v15 = vpop.f32.mrb[24].mxu0  ;;  %v1503_v16 = vadd.f32 %v2373_v22, %v1480_v8  ;;  %v1197_v17 = vadd.f32 %v1146_v7, %v1073_v53  ;;  %v1198_v20 = vadd.f32 %v1148_v10, %v1074_v9  ;;  %v1254_v21 = vmul.f32 %v2313_v50, %v2375_v25 }
 0x12b   : > { %v748_v26 = vrot.slane %v2401_v13, 1  ;;  %v873_v28 = vrot.slane %v2404_v14, 2  ;;  %v1028_v29 = vrot.slane %v2407_v63, 1  ;;  %v1152_v32 = vrot.slane %v2410_v11, 2  ;;  %v1830_v33 = vpop.f32.mrb[25].mxu0 }
 0x12c   : > { %v590_v34 = vmax.f32 %v507_v15, 0.0  ;;  %v510_v35 = vpop.f32.mrb[26].mxu0  ;;  %v1519_v36 = vmax.f32 %v1503_v16, 0.0  ;;  %v1233_v37 = vadd.f32 %v1217_v12, %v1197_v17  ;;  %v1234_v39 = vadd.f32 %v1218_v60, %v1198_v20 }
 0x12d   : > { %v591_v41 = vmax.f32 %v510_v35, 0.0  ;;  %v1831_v42 = vpop.f32.mrb[27].mxu0  ;;  %v1255_v43 = vmul.f32 %v2313_v50, %v2390_v56  ;;  %v1256_v44 = vmul.f32 %v2313_v50, %v619_v55  ;;  %v1304_v45 = vrot.slane %v1254_v21, 1 }
 0x12e   : > { %v2422_v46 = vmin.f32 %v590_v34, 6.0  ;;  %v1535_v47 = vmin.f32 %v1519_v36, 6.0  ;;  %v1378_v48 = vmul.f32 %v2317_v57, %v2375_v25  ;;  %v1379_v52 = vmul.f32 %v2317_v57, %v2390_v56 }
 0x12f   : > { %v2428_v54 = vmin.f32 %v591_v41, 6.0  ;;  %v1305_v51 = vrot.slane %v1255_v43, 1  ;;  %v1307_v59 = vrot.slane %v1256_v44, 1  ;;  %v1380_v62 = vmul.f32 %v2317_v57, %v619_v55 }
 0x130   : > { %v1550_v0 = vpack.c.bf16 %v1535_v47, %v1534_v2  ;;  %v1428_v3 = vrot.slane %v1378_v48, 2  ;;  %v1429_v4 = vrot.slane %v1379_v52, 2  ;;  %v649_v6 = vmul.f32 %v2278_v5, %v2336_v38 }
 0x131   : > { %v1306_v8 = vsel %vm729_vm4, %v1304_v45, %v1305_v51  ;;  %v1308_v53 = vsel %vm729_vm4, %v1305_v51, %v1307_v59  ;;  %v1431_v9 = vrot.slane %v1380_v62, 2  ;;  %v650_v7 = vmul.f32 %v2278_v5, %v2338_v40 }
 0x132   : > { %v1570_v10 = vsel %vm1565_vm6, %v1550_v0, 0  ;;  %v515_v12 = vpop.f32.mrb[28].mxu0  ;;  %v1357_v60 = vadd.f32 %v1306_v8, %v1233_v37  ;;  %v1358_v15 = vadd.f32 %v1308_v53, %v1234_v39  ;;  %v1430_v2 = vsel %vm854_vm5, %v1428_v3, %v1429_v4 }
 0x133   : > { %1865 = vmatpush3.bf16.xpose.msra.mxu1 %v1570_v10  ;;  %v592_v55 = vmax.f32 %v515_v12, 0.0  ;;  %v1834_v16 = vpop.f32.mrb[29].mxu0  ;;  %v1432_v17 = vsel %vm854_vm5, %v1429_v4, %v1431_v9  ;;  %v687_v20 = vmul.f32 %v2272_v58, %v2336_v38  ;;  %v688_v21 = vmul.f32 %v2272_v58, %v2338_v40 }
 0x134   : > { %v518_v33 = vpop.f32.mrb[30].mxu0  ;;  %1866 = vmatprep.subr.bf16.mxu1 %v3051_v1  ;;  %v1481_v34 = vadd.f32 %v1430_v2, %v1357_v60  ;;  %v1482_v35 = vadd.f32 %v1432_v17, %v1358_v15  ;;  %v812_v36 = vmul.f32 %v2275_v61, %v2336_v38  ;;  %v813_v37 = vmul.f32 %v2275_v61, %v2338_v40 }
 0x135   : > { %v2449_v39 = vmin.f32 %v592_v55, 6.0  ;;  %v593_v41 = vmax.f32 %v518_v33, 0.0  ;;  %v1835_v42 = vpop.f32.mrb[31].mxu0  ;;  %v740_v43 = vrot.slane %v687_v20, 1  ;;  %v741_v44 = vrot.slane %v688_v21, 1 }
 0x136   : > { %v1504_v45 = vadd.f32 %v2373_v22, %v1481_v34  ;;  %v1505_v47 = vadd.f32 %v2373_v22, %v1482_v35  ;;  %v865_v48 = vrot.slane %v812_v36, 2  ;;  %v866_v52 = vrot.slane %v813_v37, 2 }
 0x137   : > { %v2455_v51 = vmul.f32 %v2272_v58, %v2449_v39  ;;  %v2459_v38 = vmul.f32 %v2275_v61, %v2449_v39  ;;  %v2463_v40 = vmul.f32 %v2290_v24, %v2449_v39  ;;  %v2467_v59 = vmul.f32 %v2294_v27, %v2449_v39 }
 0x138   : > { %v2469_v62 = vmin.f32 %v593_v41, 6.0  ;;  %v1520_v0 = vmax.f32 %v1504_v45, 0.0  ;;  %v1521_v3 = vmax.f32 %v1505_v47, 0.0  ;;  %v742_v4 = vsel %vm729_vm4, %v740_v43, %v741_v44 }
 0x139   : > { %v753_v8 = vrot.slane %v2455_v51, 1  ;;  %v878_v53 = vrot.slane %v2459_v38, 2  ;;  %v1033_v9 = vrot.slane %v2463_v40, 1  ;;  %v1157_v10 = vrot.slane %v2467_v59, 2 }
 0x13a   : > { %v523_v12 = vpop.f32.mrb[32].mxu0  ;;  %v1536_v60 = vmin.f32 %v1520_v0, 6.0  ;;  %v1537_v15 = vmin.f32 %v1521_v3, 6.0  ;;  %v744_v2 = vsel %vm729_vm4, %v741_v44, %v743_v30  ;;  %v790_v55 = vadd.f32 %v742_v4, %v649_v6 }
 0x13b   : > { %v594_v16 = vmax.f32 %v523_v12, 0.0  ;;  %v1838_v17 = vpop.f32.mrb[33].mxu0  ;;  %v791_v20 = vadd.f32 %v744_v2, %v650_v7  ;;  %v867_v21 = vsel %vm854_vm5, %v865_v48, %v866_v52  ;;  %v869_v33 = vsel %vm854_vm5, %v866_v52, %v868_v31 }
 0x13c   : > { %v1551_v34 = vpack.c.bf16 %v1537_v15, %v1536_v60  ;;  %v526_v35 = vpop.f32.mrb[34].mxu0  ;;  %v915_v36 = vadd.f32 %v867_v21, %v790_v55  ;;  %v935_v37 = vmul.f32 %v2288_v23, %v2375_v25  ;;  %v936_v18 = vmul.f32 %v2288_v23, %v2390_v56 }
 0x13d   : > { %v2487_v30 = vmin.f32 %v594_v16, 6.0  ;;  %v595_v6 = vmax.f32 %v526_v35, 0.0  ;;  %v1839_v41 = vpop.f32.mrb[35].mxu0  ;;  %v916_v7 = vadd.f32 %v869_v33, %v791_v20  ;;  %v973_v42 = vmul.f32 %v2290_v24, %v2375_v25 }
 0x13e   : > { %v1573_v19 = vsel %vm1565_vm6, %v1551_v34, 0  ;;  %v951_v31 = vadd.f32 %v935_v37, %v915_v36  ;;  %v974_v43 = vmul.f32 %v2290_v24, %v2390_v56  ;;  %v1097_v44 = vmul.f32 %v2294_v27, %v2375_v25 }
 0x13f   : > { %1867 = vmatpush3.bf16.xpose.msra.mxu1 %v1573_v19  ;;  %v2496_v45 = vmin.f32 %v595_v6, 6.0  ;;  %v952_v47 = vadd.f32 %v936_v18, %v916_v7  ;;  %v1025_v48 = vrot.slane %v973_v42, 1  ;;  %v1098_v52 = vmul.f32 %v2294_v27, %v2390_v56 }
 0x140   : > { %1868 = vmatprep.subr.bf16.mxu1 %v3051_v1  ;;  %v1026_v0 = vrot.slane %v974_v43, 1  ;;  %v1149_v3 = vrot.slane %v1097_v44, 2  ;;  %v1219_v4 = vmul.f32 %v2311_v49, %v2422_v46  ;;  %v1220_v12 = vmul.f32 %v2311_v49, %v2428_v54 }
 0x141   : > { %v2507_v60 = vmul.f32 %v2272_v58, %v2496_v45  ;;  %v2511_v15 = vmul.f32 %v2275_v61, %v2496_v45  ;;  %v2515_v2 = vmul.f32 %v2290_v24, %v2496_v45  ;;  %v2519_v55 = vmul.f32 %v2294_v27, %v2496_v45 }
 0x142   : > { %v531_v16 = vpop.f32.mrb[36].mxu0  ;;  %v1027_v17 = vsel %vm729_vm4, %v1025_v48, %v1026_v0  ;;  %v1029_v20 = vsel %vm729_vm4, %v1026_v0, %v1028_v29  ;;  %v1150_v21 = vrot.slane %v1098_v52, 2  ;;  %v1257_v33 = vmul.f32 %v2313_v50, %v2422_v46 }
 0x143   : > { %v1038_v36 = vrot.slane %v2515_v2, 1  ;;  %v1842_v18 = vpop.f32.mrb[37].mxu0  ;;  %v596_v6 = vmax.f32 %v531_v16, 0.0  ;;  %v1075_v7 = vadd.f32 %v1027_v17, %v951_v31  ;;  %v1076_v42 = vadd.f32 %v1029_v20, %v952_v47 }
 0x144   : > { %v534_v41 = vpop.f32.mrb[38].mxu0  ;;  %v1151_v63 = vsel %vm854_vm5, %v1149_v3, %v1150_v21  ;;  %v1153_v43 = vsel %vm854_vm5, %v1150_v21, %v1152_v32  ;;  %v1258_v44 = vmul.f32 %v2313_v50, %v2428_v54  ;;  %v1259_v48 = vmul.f32 %v2313_v50, %v2449_v39 }
 0x145   : > { %v597_v29 = vmax.f32 %v534_v41, 0.0  ;;  %v1843_v19 = vpop.f32.mrb[39].mxu0  ;;  %v2539_v52 = vmin.f32 %v596_v6, 6.0  ;;  %v1199_v0 = vadd.f32 %v1151_v63, %v1075_v7  ;;  %v1200_v16 = vadd.f32 %v1153_v43, %v1076_v42 }
 0x146   : > { %v1309_v31 = vrot.slane %v1257_v33, 1  ;;  %v1310_v3 = vrot.slane %v1258_v44, 1  ;;  %v1312_v17 = vrot.slane %v1259_v48, 1  ;;  %v1381_v11 = vmul.f32 %v2317_v57, %v2422_v46 }
 0x147   : > { %v2541_v47 = vmin.f32 %v597_v29, 6.0  ;;  %v1235_v20 = vadd.f32 %v1219_v4, %v1199_v0  ;;  %v1236_v32 = vadd.f32 %v1220_v12, %v1200_v16  ;;  %v1382_v21 = vmul.f32 %v2317_v57, %v2428_v54 }
 0x148   : > { %v1383_v18 = vmul.f32 %v2317_v57, %v2449_v39  ;;  %v1311_v6 = vsel %vm729_vm4, %v1309_v31, %v1310_v3  ;;  %v1313_v41 = vsel %vm729_vm4, %v1310_v3, %v1312_v17  ;;  %v1433_v33 = vrot.slane %v1381_v11, 2 }
 0x149   : > { %v651_v7 = vmul.f32 %v2278_v5, %v2375_v25  ;;  %v1359_v42 = vadd.f32 %v1311_v6, %v1235_v20  ;;  %v1360_v63 = vadd.f32 %v1313_v41, %v1236_v32  ;;  %v1434_v29 = vrot.slane %v1382_v21, 2 }
 0x14a   : > { %v1436_v19 = vrot.slane %v1383_v18, 2  ;;  %v539_v4 = vpop.f32.mrb[40].mxu0  ;;  %v652_v44 = vmul.f32 %v2278_v5, %v2390_v56  ;;  %v690_v39 = vmul.f32 %v2272_v58, %v2375_v25  ;;  %v691_v48 = vmul.f32 %v2272_v58, %v2390_v56 }
 0x14b   : > { %v598_v12 = vmax.f32 %v539_v4, 0.0  ;;  %v1846_v43 = vpop.f32.mrb[41].mxu0  ;;  %v1435_v0 = vsel %vm854_vm5, %v1433_v33, %v1434_v29  ;;  %v815_v3 = vmul.f32 %v2275_v61, %v2375_v25  ;;  %v816_v17 = vmul.f32 %v2275_v61, %v2390_v56 }
 0x14c   : > { %v1437_v16 = vsel %vm854_vm5, %v1434_v29, %v1436_v19  ;;  %v542_v31 = vpop.f32.mrb[42].mxu0  ;;  %v1483_v11 = vadd.f32 %v1435_v0, %v1359_v42  ;;  %v745_v6 = vrot.slane %v690_v39, 1  ;;  %v746_v41 = vrot.slane %v691_v48, 1 }
 0x14d   : > { %v1484_v20 = vadd.f32 %v1437_v16, %v1360_v63  ;;  %v2565_v32 = vmin.f32 %v598_v12, 6.0  ;;  %v599_v21 = vmax.f32 %v542_v31, 0.0  ;;  %v1847_v18 = vpop.f32.mrb[43].mxu0  ;;  %v870_v4 = vrot.slane %v815_v3, 2 }
 0x14e   : > { %v871_v43 = vrot.slane %v816_v17, 2  ;;  %v1506_v33 = vadd.f32 %v2373_v22, %v1483_v11  ;;  %v747_v12 = vsel %vm729_vm4, %v745_v6, %v746_v41  ;;  %v749_v11 = vsel %vm729_vm4, %v746_v41, %v748_v26 }
 0x14f   : > { %v1507_v29 = vadd.f32 %v2373_v22, %v1484_v20  ;;  %v2571_v25 = vmul.f32 %v2272_v58, %v2565_v32  ;;  %v2575_v56 = vmul.f32 %v2275_v61, %v2565_v32  ;;  %v2579_v42 = vmul.f32 %v2290_v24, %v2565_v32 }
 0x150   : > { %v2583_v63 = vmul.f32 %v2294_v27, %v2565_v32  ;;  %v2585_v19 = vmin.f32 %v599_v21, 6.0  ;;  %v1522_v39 = vmax.f32 %v1506_v33, 0.0  ;;  %v792_v20 = vadd.f32 %v747_v12, %v651_v7 }
 0x151   : > { %v1523_v48 = vmax.f32 %v1507_v29, 0.0  ;;  %v793_v33 = vadd.f32 %v749_v11, %v652_v44  ;;  %v872_v29 = vsel %vm854_vm5, %v870_v4, %v871_v43  ;;  %v874_v16 = vsel %vm854_vm5, %v871_v43, %v873_v28 }
 0x152   : > { %v547_v17 = vpop.f32.mrb[44].mxu0  ;;  %v1538_v21 = vmin.f32 %v1522_v39, 6.0  ;;  %v937_v0 = vmul.f32 %v2288_v23, %v2422_v46  ;;  %v938_v13 = vmul.f32 %v2288_v23, %v2428_v54  ;;  %v917_v41 = vadd.f32 %v872_v29, %v792_v20 }
 0x153   : > { %v1539_v18 = vmin.f32 %v1523_v48, 6.0  ;;  %v600_v35 = vmax.f32 %v547_v17, 0.0  ;;  %v1850_v6 = vpop.f32.mrb[45].mxu0  ;;  %v918_v12 = vadd.f32 %v874_v16, %v793_v33  ;;  %v976_v44 = vmul.f32 %v2290_v24, %v2422_v46 }
 0x154   : > { %v550_v3 = vpop.f32.mrb[46].mxu0  ;;  %v977_v14 = vmul.f32 %v2290_v24, %v2428_v54  ;;  %v1100_v28 = vmul.f32 %v2294_v27, %v2422_v46  ;;  %v1101_v4 = vmul.f32 %v2294_v27, %v2428_v54  ;;  %v953_v48 = vadd.f32 %v937_v0, %v917_v41 }
 0x155   : > { %v1552_v26 = vpack.c.bf16 %v1539_v18, %v1538_v21  ;;  %v2603_v7 = vmin.f32 %v600_v35, 6.0  ;;  %v1851_v39 = vpop.f32.mrb[47].mxu0  ;;  %v954_v35 = vadd.f32 %v938_v13, %v918_v12  ;;  %v1221_v16 = vmul.f32 %v2311_v49, %v2469_v62 }
 0x156   : > { %v1030_v17 = vrot.slane %v976_v44, 1  ;;  %v1031_v11 = vrot.slane %v977_v14, 1  ;;  %v1154_v20 = vrot.slane %v1100_v28, 2  ;;  %v1155_v21 = vrot.slane %v1101_v4, 2 }
 0x157   : > { %v1576_v43 = vsel %vm1565_vm6, %v1552_v26, 0  ;;  %v1222_v18 = vmul.f32 %v2311_v49, %v2487_v30  ;;  %v1260_v6 = vmul.f32 %v2313_v50, %v2469_v62  ;;  %v1261_v0 = vmul.f32 %v2313_v50, %v2487_v30 }
 0x158   : > { %1869 = vmatpush3.bf16.xpose.msra.mxu1 %v1576_v43  ;;  %v1262_v33 = vmul.f32 %v2313_v50, %v2496_v45  ;;  %v1032_v29 = vsel %vm729_vm4, %v1030_v17, %v1031_v11  ;;  %v1034_v13 = vsel %vm729_vm4, %v1031_v11, %v1033_v9  ;;  %v1156_v26 = vsel %vm854_vm5, %v1154_v20, %v1155_v21 }
 0x159   : > { %1870 = vmatprep.subr.bf16.mxu1 %v3051_v1  ;;  %v1158_v41 = vsel %vm854_vm5, %v1155_v21, %v1157_v10  ;;  %v1077_v39 = vadd.f32 %v1032_v29, %v953_v48  ;;  %v1078_v44 = vadd.f32 %v1034_v13, %v954_v35  ;;  %v1314_v14 = vrot.slane %v1260_v6, 1 }
 0x15a   : > { %v555_v12 = vpop.f32.mrb[48].mxu0  ;;  %v1315_v28 = vrot.slane %v1261_v0, 1  ;;  %v1317_v43 = vrot.slane %v1262_v33, 1  ;;  %v1384_v17 = vmul.f32 %v2317_v57, %v2469_v62  ;;  %v1385_v40 = vmul.f32 %v2317_v57, %v2487_v30 }
 0x15b   : > { %v1854_v4 = vpop.f32.mrb[49].mxu0  ;;  %v1386_v9 = vmul.f32 %v2317_v57, %v2496_v45  ;;  %v1201_v59 = vadd.f32 %v1156_v26, %v1077_v39  ;;  %v1202_v20 = vadd.f32 %v1158_v41, %v1078_v44  ;;  %v601_v48 = vmax.f32 %v550_v3, 0.0 }
 0x15c   : > { %v558_v11 = vpop.f32.mrb[50].mxu0  ;;  %v1316_v10 = vsel %vm729_vm4, %v1314_v14, %v1315_v28  ;;  %v1318_v21 = vsel %vm729_vm4, %v1315_v28, %v1317_v43  ;;  %v1438_v6 = vrot.slane %v1384_v17, 2  ;;  %v1439_v0 = vrot.slane %v1385_v40, 2 }
 0x15d   : > { %v1855_v35 = vpop.f32.mrb[51].mxu0  ;;  %v1441_v33 = vrot.slane %v1386_v9, 2  ;;  %v1237_v29 = vadd.f32 %v1221_v16, %v1201_v59  ;;  %v1238_v13 = vadd.f32 %v1222_v18, %v1202_v20  ;;  %v2641_v4 = vmin.f32 %v601_v48, 6.0 }
 0x15e   : > { %v602_v31 = vmax.f32 %v555_v12, 0.0  ;;  %v1440_v34 = vsel %vm854_vm5, %v1438_v6, %v1439_v0  ;;  %v603_v26 = vmax.f32 %v558_v11, 0.0  ;;  %v653_v41 = vmul.f32 %v2278_v5, %v2422_v46 }
 0x15f   : > { %v1442_v45 = vsel %vm854_vm5, %v1439_v0, %v1441_v33  ;;  %v1361_v3 = vadd.f32 %v1316_v10, %v1237_v29  ;;  %v1362_v39 = vadd.f32 %v1318_v21, %v1238_v13  ;;  %v2649_v44 = vmul.f32 %v2272_v58, %v2641_v4 }
 0x160   : > { %v2653_v16 = vmul.f32 %v2275_v61, %v2641_v4  ;;  %v2657_v18 = vmul.f32 %v2290_v24, %v2641_v4  ;;  %v2661_v12 = vmul.f32 %v2294_v27, %v2641_v4  ;;  %v2663_v14 = vmin.f32 %v602_v31, 6.0 }
 0x161   : > { %v2665_v28 = vmin.f32 %v603_v26, 6.0  ;;  %v1485_v17 = vadd.f32 %v1440_v34, %v1361_v3  ;;  %v1486_v40 = vadd.f32 %v1442_v45, %v1362_v39  ;;  %v654_v48 = vmul.f32 %v2278_v5, %v2428_v54 }
 0x162   : > { %v2667_v43 = vpop.f32.mrb[52].mxu0  ;;  %v693_v31 = vmul.f32 %v2272_v58, %v2422_v46  ;;  %v694_v6 = vmul.f32 %v2272_v58, %v2428_v54  ;;  %v818_v0 = vmul.f32 %v2275_v61, %v2422_v46  ;;  %v819_v13 = vmul.f32 %v2275_v61, %v2428_v54 }
 0x163   : > { %v1858_v59 = vpop.f32.mrb[53].mxu0  ;;  %v1508_v34 = vadd.f32 %v2373_v22, %v1485_v17  ;;  %v1509_v21 = vadd.f32 %v2373_v22, %v1486_v40  ;;  %v939_v45 = vmul.f32 %v2288_v23, %v2469_v62  ;;  %v940_v26 = vmul.f32 %v2288_v23, %v2487_v30 }
 0x164   : > { %v2677_v35 = vpop.f32.mrb[54].mxu0  ;;  %v750_v29 = vrot.slane %v693_v31, 1  ;;  %v751_v17 = vrot.slane %v694_v6, 1  ;;  %v875_v40 = vrot.slane %v818_v0, 2  ;;  %v876_v59 = vrot.slane %v819_v13, 2 }
 0x165   : > { %v1859_v33 = vpop.f32.mrb[55].mxu0  ;;  %v1524_v3 = vmax.f32 %v1508_v34, 0.0  ;;  %v1525_v39 = vmax.f32 %v1509_v21, 0.0  ;;  %v979_v10 = vmul.f32 %v2290_v24, %v2469_v62  ;;  %v980_v46 = vmul.f32 %v2290_v24, %v2487_v30 }
 0x166   : > { %v1103_v54 = vmul.f32 %v2294_v27, %v2469_v62  ;;  %v752_v20 = vsel %vm729_vm4, %v750_v29, %v751_v17  ;;  %v754_v34 = vsel %vm729_vm4, %v751_v17, %v753_v8  ;;  %v877_v0 = vsel %vm854_vm5, %v875_v40, %v876_v59 }
 0x167   : > { %v1540_v31 = vmin.f32 %v1524_v3, 6.0  ;;  %v1541_v33 = vmin.f32 %v1525_v39, 6.0  ;;  %v794_v21 = vadd.f32 %v752_v20, %v653_v41  ;;  %v795_v6 = vadd.f32 %v754_v34, %v654_v48 }
 0x168   : > { %v879_v13 = vsel %vm854_vm5, %v876_v59, %v878_v53  ;;  %v1035_v37 = vrot.slane %v979_v10, 1  ;;  %v1036_v3 = vrot.slane %v980_v46, 1  ;;  %v1104_v29 = vmul.f32 %v2294_v27, %v2487_v30 }
 0x169   : > { %v1553_v9 = vpack.c.bf16 %v1541_v33, %v1540_v31  ;;  %v919_v51 = vadd.f32 %v877_v0, %v794_v21  ;;  %v920_v1 = vadd.f32 %v879_v13, %v795_v6  ;;  %v1159_v8 = vrot.slane %v1103_v54, 2 }
 0x16a   : > { %v2705_v11 = vpop.f32.mrb[56].mxu0  ;;  %v1223_v41 = vmul.f32 %v2311_v49, %v2539_v52  ;;  %v1037_v53 = vsel %vm729_vm4, %v1035_v37, %v1036_v3  ;;  %v1039_v10 = vsel %vm729_vm4, %v1036_v3, %v1038_v36  ;;  %v1160_v48 = vrot.slane %v1104_v29, 2 }
 0x16b   : > { %v1862_v39 = vpop.f32.mrb[57].mxu0  ;;  %v1579_v38 = vsel %vm1565_vm6, %v1553_v9, 0  ;;  %v955_v40 = vadd.f32 %v939_v45, %v919_v51  ;;  %v956_v59 = vadd.f32 %v940_v26, %v920_v1  ;;  %v1224_v46 = vmul.f32 %v2311_v49, %v2541_v47 }
 0x16c   : > { %v2711_v20 = vpop.f32.mrb[58].mxu0  ;;  %1871 = vmatpush3.bf16.xpose.msra.mxu1 %v1579_v38  ;;  %v1263_v54 = vmul.f32 %v2313_v50, %v2539_v52  ;;  %v3064_v31 = vmov 0.0   ;;  %v1161_v9 = vsel %vm854_vm5, %v1159_v8, %v1160_v48  ;;  %v3065_v37 = vrot.slane %v2519_v55, 2 }
 0x16d   : > { %v1863_v17 = vpop.f32.mrb[59].mxu0  ;;  %1872 = vmatprep.subr.bf16.mxu1 %v3064_v31  ;;  %v1264_v36 = vmul.f32 %v2313_v50, %v2541_v47  ;;  %v1265_v1 = vmul.f32 %v2313_v50, %v2565_v32  ;;  %v1079_v45 = vadd.f32 %v1037_v53, %v955_v40  ;;  %v1080_v26 = vadd.f32 %v1039_v10, %v956_v59 }
 0x16e   : > { %v1163_v2 = vsel %vm854_vm5, %v1160_v48, %v3065_v37  ;;  %v1319_v33 = vrot.slane %v1263_v54, 1  ;;  %v1387_v34 = vmul.f32 %v2317_v57, %v2539_v52  ;;  %v1388_v0 = vmul.f32 %v2317_v57, %v2541_v47 }
 0x16f   : > { %v1320_v21 = vrot.slane %v1264_v36, 1  ;;  %v1322_v6 = vrot.slane %v1265_v1, 1  ;;  %v1389_v55 = vmul.f32 %v2317_v57, %v2565_v32  ;;  %v1203_v13 = vadd.f32 %v1161_v9, %v1079_v45 }
 0x170   : > { %v1204_v3 = vadd.f32 %v1163_v2, %v1080_v26  ;;  %v1443_v29 = vrot.slane %v1387_v34, 2  ;;  %v604_v39 = vmax.f32 %v2667_v43, 0.0  ;;  %v1444_v38 = vrot.slane %v1388_v0, 2 }
 0x171   : > { %v1321_v51 = vsel %vm729_vm4, %v1319_v33, %v1320_v21  ;;  %v1323_v8 = vsel %vm729_vm4, %v1320_v21, %v1322_v6  ;;  %v1446_v53 = vrot.slane %v1389_v55, 2  ;;  %v1239_v10 = vadd.f32 %v1223_v41, %v1203_v13 }
 0x172   : > { %v1240_v48 = vadd.f32 %v1224_v46, %v1204_v3  ;;  %v634_v17 = vmin.f32 %v604_v39, 6.0  ;;  %v605_v40 = vmax.f32 %v2677_v35, 0.0  ;;  %v1445_v59 = vsel %vm854_vm5, %v1443_v29, %v1444_v38 }
 0x173   : > { %v1447_v32 = vsel %vm854_vm5, %v1444_v38, %v1446_v53  ;;  %v659_v54 = vmul.f32 %v2278_v5, %v2585_v19  ;;  %v702_v43 = vmul.f32 %v2272_v58, %v2585_v19  ;;  %v1363_v9 = vadd.f32 %v1321_v51, %v1239_v10 }
 0x174   : > { %v1364_v37 = vadd.f32 %v1323_v8, %v1240_v48  ;;  %v990_v2 = vmul.f32 %v2290_v24, %v634_v17  ;;  %v1114_v41 = vmul.f32 %v2294_v27, %v634_v17  ;;  %v2750_v46 = vmul.f32 %v2313_v50, %v634_v17 }
 0x175   : > { %v2753_v35 = vmul.f32 %v2317_v57, %v634_v17  ;;  %v635_v36 = vmin.f32 %v605_v40, 6.0  ;;  %v703_v1 = vmul.f32 %v2272_v58, %v2603_v7  ;;  %v1487_v45 = vadd.f32 %v1445_v59, %v1363_v9 }
 0x176   : > { %v1488_v26 = vadd.f32 %v1447_v32, %v1364_v37  ;;  %v1053_v33 = vrot.slane %v990_v2, 1  ;;  %v1177_v34 = vrot.slane %v1114_v41, 2  ;;  %v1332_v21 = vrot.slane %v2750_v46, 1 }
 0x177   : > { %v1456_v6 = vrot.slane %v2753_v35, 2  ;;  %v765_v0 = vrot.slane %v702_v43, 1  ;;  %v766_v55 = vrot.slane %v703_v1, 1  ;;  %v1510_v13 = vadd.f32 %v2373_v22, %v1487_v45 }
 0x178   : > { %v1511_v3 = vadd.f32 %v2373_v22, %v1488_v26  ;;  %v827_v29 = vmul.f32 %v2275_v61, %v2585_v19  ;;  %v828_v39 = vmul.f32 %v2275_v61, %v2603_v7  ;;  %v945_v8 = vmul.f32 %v2288_v23, %v2663_v14 }
 0x179   : > { %v767_v51 = vsel %vm729_vm4, %v765_v0, %v766_v55  ;;  %v988_v38 = vmul.f32 %v2290_v24, %v2663_v14  ;;  %v989_v53 = vmul.f32 %v2290_v24, %v2665_v28  ;;  %v1526_v10 = vmax.f32 %v1510_v13, 0.0 }
 0x17a   : > { %v1527_v48 = vmax.f32 %v1511_v3, 0.0  ;;  %v800_v22 = vadd.f32 %v767_v51, %v659_v54  ;;  %v890_v17 = vrot.slane %v827_v29, 2  ;;  %v891_v40 = vrot.slane %v828_v39, 2 }
 0x17b   : > { %v1050_v59 = vrot.slane %v988_v38, 1  ;;  %v1051_v32 = vrot.slane %v989_v53, 1  ;;  %v1112_v43 = vmul.f32 %v2294_v27, %v2663_v14  ;;  %v1542_v9 = vmin.f32 %v1526_v10, 6.0 }
 0x17c   : > { %v1543_v37 = vmin.f32 %v1527_v48, 6.0  ;;  %v1113_v2 = vmul.f32 %v2294_v27, %v2665_v28  ;;  %v1229_v41 = vmul.f32 %v2311_v49, %v635_v36  ;;  %v892_v1 = vsel %vm854_vm5, %v890_v17, %v891_v40 }
 0x17d   : > { %v1052_v45 = vsel %vm729_vm4, %v1050_v59, %v1051_v32  ;;  %v1174_v26 = vrot.slane %v1112_v43, 2  ;;  %v1272_v54 = vmul.f32 %v2313_v50, %v635_v36  ;;  %v925_v13 = vadd.f32 %v892_v1, %v800_v22 }
 0x17e   : > { %v1554_v0 = vpack.c.bf16 %v1543_v37, %v1542_v9  ;;  %v1175_v3 = vrot.slane %v1113_v2, 2  ;;  %v2781_v29 = vmul.f32 %v2317_v57, %v635_v36  ;;  %v606_v51 = vmax.f32 %v2705_v11, 0.0 }
 0x17f   : > { %v1334_v39 = vrot.slane %v1272_v54, 1  ;;  %v660_v38 = vmul.f32 %v2278_v5, %v2603_v7  ;;  %v3066_v53 = vrot.slane %v2649_v44, 1  ;;  %v961_v17 = vadd.f32 %v945_v8, %v925_v13 }
 0x180   : > { %v1582_v48 = vsel %vm1565_vm6, %v1554_v0, 0  ;;  %v1176_v59 = vsel %vm854_vm5, %v1174_v26, %v1175_v3  ;;  %v1458_v22 = vrot.slane %v2781_v29, 2  ;;  %v636_v36 = vmin.f32 %v606_v51, 6.0 }
 0x181   : > { %v769_v10 = vsel %vm729_vm4, %v766_v55, %v3066_v53  ;;  %1873 = vmatpush3.bf16.xpose.msra.mxu1 %v1582_v48  ;;  %v3067_v9 = vrot.slane %v2653_v16, 2  ;;  %v946_v37 = vmul.f32 %v2288_v23, %v2665_v28  ;;  %v1085_v44 = vadd.f32 %v1052_v45, %v961_v17 }
 0x182   : > { %v801_v43 = vadd.f32 %v769_v10, %v660_v38  ;;  %v1054_v55 = vsel %vm729_vm4, %v1051_v32, %v1053_v33  ;;  %v1178_v2 = vsel %vm854_vm5, %v1175_v3, %v1177_v34  ;;  %1874 = vmatprep.subr.bf16.mxu1 %v3064_v31  ;;  %v655_v8 = vmul.f32 %v2278_v5, %v2469_v62 }
 0x183   : > { %v894_v11 = vsel %vm854_vm5, %v891_v40, %v3067_v9  ;;  %v1230_v26 = vmul.f32 %v2311_v49, %v636_v36  ;;  %v2804_v16 = vmul.f32 %v2313_v50, %v636_v36  ;;  %v2807_v40 = vmul.f32 %v2317_v57, %v636_v36 }
 0x184   : > { %v926_v1 = vadd.f32 %v894_v11, %v801_v43  ;;  %v1209_v54 = vadd.f32 %v1176_v59, %v1085_v44  ;;  %v656_v33 = vmul.f32 %v2278_v5, %v2487_v30  ;;  %v696_v34 = vmul.f32 %v2272_v58, %v2469_v62 }
 0x185   : > { %v697_v32 = vmul.f32 %v2272_v58, %v2487_v30  ;;  %v1335_v0 = vrot.slane %v2804_v16, 1  ;;  %v1459_v13 = vrot.slane %v2807_v40, 2  ;;  %v821_v3 = vmul.f32 %v2275_v61, %v2469_v62 }
 0x186   : > { %v962_v45 = vadd.f32 %v946_v37, %v926_v1  ;;  %v2819_v51 = vadd.f32 %v1229_v41, %v1209_v54  ;;  %v755_v38 = vrot.slane %v696_v34, 1  ;;  %v822_v10 = vmul.f32 %v2275_v61, %v2487_v30 }
 0x187   : > { %v756_v53 = vrot.slane %v697_v32, 1  ;;  %v2826_v17 = vsel %vm729_vm4, %v1334_v39, %v1335_v0  ;;  %v880_v59 = vrot.slane %v821_v3, 2  ;;  %v941_v36 = vmul.f32 %v2288_v23, %v2539_v52 }
 0x188   : > { %v1086_v48 = vadd.f32 %v1054_v55, %v962_v45  ;;  %v3068_v62 = vrot.slane %v2507_v60, 1  ;;  %v881_v9 = vrot.slane %v822_v10, 2  ;;  %v942_v30 = vmul.f32 %v2288_v23, %v2541_v47 }
 0x189   : > { %v757_v43 = vsel %vm729_vm4, %v755_v38, %v756_v53  ;;  %v982_v39 = vmul.f32 %v2290_v24, %v2539_v52  ;;  %v3069_v1 = vrot.slane %v2511_v15, 2  ;;  %v983_v60 = vmul.f32 %v2290_v24, %v2541_v47 }
 0x18a   : > { %v759_v41 = vsel %vm729_vm4, %v756_v53, %v3068_v62  ;;  %v1210_v11 = vadd.f32 %v1178_v2, %v1086_v48  ;;  %v796_v37 = vadd.f32 %v757_v43, %v655_v8  ;;  %v882_v55 = vsel %vm854_vm5, %v880_v59, %v881_v9 }
 0x18b   : > { %v797_v44 = vadd.f32 %v759_v41, %v656_v33  ;;  %v884_v54 = vsel %vm854_vm5, %v881_v9, %v3069_v1  ;;  %v1106_v34 = vmul.f32 %v2294_v27, %v2539_v52  ;;  %v1040_v33 = vrot.slane %v982_v39, 1 }
 0x18c   : > { %v2846_v32 = vadd.f32 %v1230_v26, %v1210_v11  ;;  %v921_v2 = vadd.f32 %v882_v55, %v796_v37  ;;  %v1041_v45 = vrot.slane %v983_v60, 1  ;;  %v1107_v3 = vmul.f32 %v2294_v27, %v2541_v47 }
 0x18d   : > { %v922_v8 = vadd.f32 %v884_v54, %v797_v44  ;;  %v1164_v38 = vrot.slane %v1106_v34, 2  ;;  %v1225_v15 = vmul.f32 %v2311_v49, %v2585_v19  ;;  %v1226_v48 = vmul.f32 %v2311_v49, %v2603_v7 }
 0x18e   : > { %v957_v53 = vadd.f32 %v941_v36, %v921_v2  ;;  %v1266_v26 = vmul.f32 %v2313_v50, %v2585_v19  ;;  %v1042_v59 = vsel %vm729_vm4, %v1040_v33, %v1041_v45  ;;  %v3070_v43 = vrot.slane %v2579_v42, 1 }
 0x18f   : > { %v958_v10 = vadd.f32 %v942_v30, %v922_v8  ;;  %v1165_v41 = vrot.slane %v1107_v3, 2  ;;  %v1267_v9 = vmul.f32 %v2313_v50, %v2603_v7  ;;  %v1268_v36 = vmul.f32 %v2313_v50, %v2641_v4 }
 0x190   : > { %v1044_v62 = vsel %vm729_vm4, %v1041_v45, %v3070_v43  ;;  %v1081_v11 = vadd.f32 %v1042_v59, %v957_v53  ;;  %v1324_v30 = vrot.slane %v1266_v26, 1  ;;  %v3071_v39 = vrot.slane %v2583_v63, 2 }
 0x191   : > { %v1082_v37 = vadd.f32 %v1044_v62, %v958_v10  ;;  %v1166_v44 = vsel %vm854_vm5, %v1164_v38, %v1165_v41  ;;  %v1325_v1 = vrot.slane %v1267_v9, 1  ;;  %v1390_v42 = vmul.f32 %v2317_v57, %v2585_v19 }
 0x192   : > { %v1168_v55 = vsel %vm854_vm5, %v1165_v41, %v3071_v39  ;;  %v1205_v54 = vadd.f32 %v1166_v44, %v1081_v11  ;;  %v1327_v34 = vrot.slane %v1268_v36, 1  ;;  %v1391_v2 = vmul.f32 %v2317_v57, %v2603_v7 }
 0x193   : > { %v1206_v60 = vadd.f32 %v1168_v55, %v1082_v37  ;;  %v1326_v8 = vsel %vm729_vm4, %v1324_v30, %v1325_v1  ;;  %v1392_v33 = vmul.f32 %v2317_v57, %v2641_v4  ;;  %v1448_v45 = vrot.slane %v1390_v42, 2 }
 0x194   : > { %v607_v63 = vmax.f32 %v2711_v20, 0.0  ;;  %v1241_v3 = vadd.f32 %v1225_v15, %v1205_v54  ;;  %v1328_v53 = vsel %vm729_vm4, %v1325_v1, %v1327_v34  ;;  %v1449_v10 = vrot.slane %v1391_v2, 2  ;;  %v2896_v54 = vld [vmem:[%s3063_s4] ss:$0 sm:$0xff]  ;;  %s1648_s4 = sadd.s32 %s2040_s27, %s1773_s21 }
 0x195   : > { %v1242_v38 = vadd.f32 %v1226_v48, %v1206_v60  ;;  %v1451_v26 = vrot.slane %v1392_v33, 2  ;;  %v657_v43 = vmul.f32 %v2278_v5, %v2539_v52  ;;  %v658_v62 = vmul.f32 %v2278_v5, %v2541_v47  ;;  %s1774_s23 = sshll.u32 %s1648_s4, 6 }
 0x196   : > { %v637_v59 = vmin.f32 %v607_v63, 6.0  ;;  %v1365_v41 = vadd.f32 %v1326_v8, %v1241_v3  ;;  %v1450_v4 = vsel %vm854_vm5, %v1448_v45, %v1449_v10  ;;  %v699_v20 = vmul.f32 %v2272_v58, %v2539_v52  ;;  %s2990_s28 = scalar_lea.hbm %s3050_s7, %s1774_s23 }
 0x197   : > { %v1366_v9 = vadd.f32 %v1328_v53, %v1242_v38  ;;  %v1452_v15 = vsel %vm854_vm5, %v1449_v10, %v1451_v26  ;;  %v700_v37 = vmul.f32 %v2272_v58, %v2541_v47  ;;  %v824_v5 = vmul.f32 %v2275_v61, %v2539_v52 }
 0x198   : > { %v1274_v48 = vmul.f32 %v2313_v50, %v637_v59  ;;  %v1398_v11 = vmul.f32 %v2317_v57, %v637_v59  ;;  %v1489_v36 = vadd.f32 %v1450_v4, %v1365_v41  ;;  %v760_v44 = vrot.slane %v699_v20, 1 }
 0x199   : > { %v1490_v30 = vadd.f32 %v1452_v15, %v1366_v9  ;;  %v761_v1 = vrot.slane %v700_v37, 1  ;;  %v825_v42 = vmul.f32 %v2275_v61, %v2541_v47  ;;  %v885_v34 = vrot.slane %v824_v5, 2 }
 0x19a   : > { %v1337_v39 = vrot.slane %v1274_v48, 1  ;;  %v1461_v55 = vrot.slane %v1398_v11, 2  ;;  %v1512_v60 = vadd.f32 %v2896_v54, %v1489_v36  ;;  %v943_v2 = vmul.f32 %v2288_v23, %v2585_v19 }
 0x19b   : > { %v1513_v58 = vadd.f32 %v2896_v54, %v1490_v30  ;;  %v762_v47 = vsel %vm729_vm4, %v760_v44, %v761_v1  ;;  %v3072_v8 = vrot.slane %v2571_v25, 1  ;;  %v886_v10 = vrot.slane %v825_v42, 2 }
 0x19c   : > { %v1338_v52 = vsel %vm729_vm4, %v1335_v0, %v1337_v39  ;;  %v1462_v61 = vsel %vm854_vm5, %v1459_v13, %v1461_v55  ;;  %v1528_v45 = vmax.f32 %v1512_v60, 0.0  ;;  %v798_v38 = vadd.f32 %v762_v47, %v657_v43 }
 0x19d   : > { %v764_v33 = vsel %vm729_vm4, %v761_v1, %v3072_v8  ;;  %v1529_v63 = vmax.f32 %v1513_v58, 0.0  ;;  %v1370_v3 = vadd.f32 %v1338_v52, %v2846_v32  ;;  %v944_v16 = vmul.f32 %v2288_v23, %v2603_v7 }
 0x19e   : > { %v799_v53 = vadd.f32 %v764_v33, %v658_v62  ;;  %v985_v0 = vmul.f32 %v2290_v24, %v2585_v19  ;;  %v1544_v26 = vmin.f32 %v1528_v45, 6.0  ;;  %v986_v25 = vmul.f32 %v2290_v24, %v2603_v7 }
 0x19f   : > { %v1545_v59 = vmin.f32 %v1529_v63, 6.0  ;;  %v1109_v41 = vmul.f32 %v2294_v27, %v2585_v19  ;;  %v887_v9 = vsel %vm854_vm5, %v885_v34, %v886_v10  ;;  %v3073_v32 = vrot.slane %v2575_v56, 2 }
 0x1a0   : > { %v1045_v62 = vrot.slane %v985_v0, 1  ;;  %v1110_v23 = vmul.f32 %v2294_v27, %v2603_v7  ;;  %v923_v20 = vadd.f32 %v887_v9, %v798_v38  ;;  %v1046_v48 = vrot.slane %v986_v25, 1 }
 0x1a1   : > { %v889_v43 = vsel %vm854_vm5, %v886_v10, %v3073_v32  ;;  %v1555_v4 = vpack.c.bf16 %v1545_v59, %v1544_v26  ;;  %v1169_v11 = vrot.slane %v1109_v41, 2  ;;  %v1227_v24 = vmul.f32 %v2311_v49, %v2663_v14 }
 0x1a2   : > { %v924_v15 = vadd.f32 %v889_v43, %v799_v53  ;;  %v1170_v37 = vrot.slane %v1110_v23, 2  ;;  %v1228_v19 = vmul.f32 %v2311_v49, %v2665_v28  ;;  %v959_v36 = vadd.f32 %v943_v2, %v923_v20 }
 0x1a3   : > { %v1585_v56 = vsel %vm1565_vm6, %v1555_v4, 0  ;;  %v1047_v44 = vsel %vm729_vm4, %v1045_v62, %v1046_v48  ;;  %v3074_v27 = vrot.slane %v2657_v18, 1  ;;  %v3075_v39 = vrot.slane %v2661_v12, 2  ;;  %v1633_v4 = vld [vmem:[%s321_s3] sm:$0xf]  ;;  %s2062_s3 = smov [#allocation2]  }
 0x1a4   : > { %v960_v30 = vadd.f32 %v944_v16, %v924_v15  ;;  %1875 = vmatpush3.bf16.xpose.msra.mxu1 %v1585_v56  ;;  %v1171_v5 = vsel %vm854_vm5, %v1169_v11, %v1170_v37  ;;  %v1269_v49 = vmul.f32 %v2313_v50, %v2663_v14  ;;  %v1083_v1 = vadd.f32 %v1047_v44, %v959_v36  ;;  %s1966_s4 = sshll.u32 %s2062_s3, 4  ;;  %s1967_s4 = int_to_ptr.vmem [resolvable:$false] %s1966_s4 }
 0x1a5   : > { %v1049_v7 = vsel %vm729_vm4, %v1046_v48, %v3074_v27  ;;  %v1173_v55 = vsel %vm854_vm5, %v1170_v37, %v3075_v39  ;;  %1876 = vmatprep.subr.bf16.mxu1 %v3064_v31  ;;  %v1270_v60 = vmul.f32 %v2313_v50, %v2665_v28  ;;  %v1393_v18 = vmul.f32 %v2317_v57, %v2663_v14  ;;  %v1559_v14 = vld [vmem:[%s3049_s6] sm:$0xf]  ;;  %s1968_s27 = scalar_lea.vmem %s1967_s4, 128 }
 0x1a6   : > { %v1084_v42 = vadd.f32 %v1049_v7, %v960_v30  ;;  %v1329_v58 = vrot.slane %v1269_v49, 1  ;;  %v1394_v34 = vmul.f32 %v2317_v57, %v2665_v28  ;;  %v1369_v12 = vadd.f32 %v2826_v17, %v2819_v51 }
 0x1a7   : > { %v1460_v2 = vsel %vm854_vm5, %v1458_v22, %v1459_v13  ;;  %v1207_v52 = vadd.f32 %v1171_v5, %v1083_v1  ;;  %v1330_v8 = vrot.slane %v1270_v60, 1  ;;  %v1453_v50 = vrot.slane %v1393_v18, 2 }
 0x1a8   : > { %v1208_v47 = vadd.f32 %v1173_v55, %v1084_v42  ;;  %v1454_v33 = vrot.slane %v1394_v34, 2  ;;  %v1493_v45 = vadd.f32 %v1460_v2, %v1369_v12  ;;  %v1494_v57 = vadd.f32 %v1462_v61, %v1370_v3 }
 0x1a9   : > { %v1243_v28 = vadd.f32 %v1227_v24, %v1207_v52  ;;  %v1331_v51 = vsel %vm729_vm4, %v1329_v58, %v1330_v8  ;;  %v1333_v29 = vsel %vm729_vm4, %v1330_v8, %v1332_v21  ;;  %v2061_v22 = vmov 0  }
 0x1aa   : > { %v1244_v63 = vadd.f32 %v1228_v19, %v1208_v47  ;;  %1960 = vset.pattern.permute.xlu0 %v2061_v22  ;;  %v1455_v40 = vsel %vm854_vm5, %v1453_v50, %v1454_v33  ;;  %v1457_v13 = vsel %vm854_vm5, %v1454_v33, %v1456_v6  ;;  %v1516_v17 = vadd.f32 %v2896_v54, %v1493_v45 }
 0x1ab   : > { %v1517_v61 = vadd.f32 %v2896_v54, %v1494_v57  ;;  %1562 = vperm.xlu0 %1960, %v1559_v14   ;;  %v1367_v3 = vadd.f32 %v1331_v51, %v1243_v28 }
 0x1ac   : > { %v1368_v38 = vadd.f32 %v1333_v29, %v1244_v63  ;;  %v1532_v53 = vmax.f32 %v1516_v17, 0.0 }
 0x1ad   : > { %v1533_v10 = vmax.f32 %v1517_v61, 0.0  ;;  %v1491_v46 = vadd.f32 %v1455_v40, %v1367_v3 }
 0x1ae   : > { %v1492_v16 = vadd.f32 %v1457_v13, %v1368_v38  ;;  %v1548_v21 = vmin.f32 %v1532_v53, 6.0 }
 0x1af   : > { %v1549_v0 = vmin.f32 %v1533_v10, 6.0  ;;  %v1514_v26 = vadd.f32 %v2896_v54, %v1491_v46 }
 0x1b0   : > { %v1515_v35 = vadd.f32 %v2896_v54, %v1492_v16  ;;  %v1558_v54 = vld [vmem:[%s3076_s5] sm:$0x3]  ;;  %s1652_s5 = sshll.u32 %s308_s9, 4  ;;  %s2992_s5 = int_to_ptr.vmem [resolvable:$true] %s1652_s5 }
 0x1b1   : > { %v1557_v6 = vpack.c.bf16 %v1549_v0, %v1548_v21  ;;  %v1530_v59 = vmax.f32 %v1514_v26, 0.0  ;;  %s1962_s2 = scalar_lea.vmem %s2992_s5, 64  ;;  %p1969_p4 = scmp.lt.s32.totalorder %s2992_s5, %s1967_s4 }
 0x1b2   : > { %v1531_v25 = vmax.f32 %v1515_v35, 0.0  ;;  %p1963_p0 = scmp.ne.s32.totalorder %s2992_s5, %s1962_s2  ;;  %p1970_p5 = scmp.lt.s32.totalorder %s1968_s27, %s1962_s2 }
 0x1b3   : > { %v1546_v41 = vmin.f32 %v1530_v59, 6.0  ;;  %v1591_v62 = vsel %vm1565_vm6, %v1557_v6, 0 }
 0x1b4   : > { %v1547_v9 = vmin.f32 %v1531_v25, 6.0  ;;  %p1964_p1 = pnand %p1963_p0, %p2154_p3  ;;  %p1971_p6 = por %p1970_p5, %p1969_p4 }
 0x1b6   : > { %v1556_v32 = vpack.c.bf16 %v1547_v9, %v1546_v41  ;;  %p1965_p2 = pneg %p1964_p1 }
 0x1b8   : > { %v1588_v43 = vsel %vm1565_vm6, %v1556_v32, 0  ;;  %p1972_p7 = pnand %p1971_p6, %p1965_p2 }
 0x1b9   : > { %1877 = vmatpush3.bf16.xpose.msra.mxu1 %v1588_v43 }
 0x1ba   : > { %1878 = vmatprep.subr.bf16.mxu1 %v3064_v31 }
 0x1c1   : > { %1879 = vmatpush3.bf16.xpose.msra.mxu1 %v1591_v62 }
 0x1c8   : > { %1881 = vmatmul.mubr.msk.bf16.vlgmr.msra.gmra.mrb[0].mxu1 %vm1565_vm6, %v1558_v54 }
 0x22a   : > { %v1563_v31 = vpop.permute.xlu0 %1562 }
 0x29b   : > { %v1627_v23 = vpop.f32.mrb[0].mxu1 }
 0x29c   : > { %v1628_v20 = vadd.f32 %v1627_v23, %v1563_v31  ;;  %v1882_v15 = vpop.f32.mrb[1].mxu1 }
 0x29d   : > { %v1630_v48 = vpop.f32.mrb[2].mxu1 }
 0x29e   : > { %v1634_v11 = vadd.f32 %v1633_v4, %v1628_v20  ;;  %v1883_v37 = vpop.f32.mrb[3].mxu1 }
 0x2a0   : > { %1635 = vst [vmem:[%s308_s9] sm:$0xf] %v1634_v11 }
 0x2a1   : > { %1975 = shalt.err (!%p1972_p7)
}
 0x2a2   : > { %s1976_s13 = scalar_lea.hbm %s2990_s28, 64  ;;  %s1980_s18 = scalar_lea.hbm %s3050_s7, 256 }
 0x2a3   : > { %p1977_p9 = scmp.ne.s32.totalorder %s2990_s28, %s1976_s13  ;;  %p1981_p12 = scmp.lt.u32.totalorder %s2990_s28, %s3050_s7 }
 0x2a4   : > { %p1982_p13 = scmp.lt.u32.totalorder %s1980_s18, %s1976_s13  ;;  %p1984_p1 = scmp.lt.u32.totalorder %s1976_s13, %s2990_s28 }
 0x2a5   : > { %p1978_p10 = pnand %p1977_p9, %p2154_p3 }
 0x2a6   : > { %p1983_p0 = por %p1982_p13, %p1981_p12 }
 0x2a7   : > { %p1979_p11 = pneg %p1978_p10 }
 0x2a8   : > { %p1985_p2 = por %p1984_p1, %p1983_p0 }
 0x2aa   : > { %p1986_p4 = pnand %p1985_p2, %p1979_p11 }
 0x2ac   : > { %1989 = shalt.err (!%p1986_p4)
}
 0x2ad   : > { %1885 = dma.vmem_to_hbm [thread:$0]  (%p2154_p3), %s2992_s5, 64, %s2990_s28, %s1637_s0  }
 0x2ae PF: > { %p1891_p5 = scmp.ge.s32.totalorder %s2056_s8, 2  ;;  %s1664_s23 = sand.u32 1, %s2028_s24  }
 0x2af   : > { %s1665_s9 = scalar_lea.sflag [#allocation3], %s1664_s23 }
 0x2b0   : > { %p1888_p6 = pnand %p1891_p5, %p2163_p8 }
 0x2b2   : > { %2023 = dma.done.wait (!%p1888_p6), %s1665_s9, 64  }
 0x2b3   : > { %2025 = vsyncadd (!%p1888_p6), %s1665_s9, 4294967232  ;;  %s20_s8 = sadd.s32 1, %s2056_s8   ;;  %s3077_s24 = smov %s2032_s25 }
 0x2b4   : > { %p17_p7 = scmp.ge.s32.totalorder %s20_s8, 6   ;;  %s3078_s25 = smov %s2036_s26 }
 0x2b5   : > { %s3079_s26 = smov %s2172_s19  ;;  %s3080_s27 = smov %s2048_s29 }
 0x2b6   : > { %s3081_s28 = smov %s2052_s30  ;;  %s3082_s29 = smov %s3085_s11 }
 0x2b7   : > { %s3083_s30 = smov %s3089_s12  ;;  %19 = sbr.rel (!%p17_p7) target bundleno = 11 (0xb), region = 87 }
 0x2be   :  { %1670 = vsyncpa [#allocation3], 1 }
 0x2bf   :  { %1672 = vsyncpa [#allocation3 + $0x1], 1 }

</bundles_post_ra>
